<compile_context>
chip_gen: v5e
topology: v5e:2x2
jax: 0.10.0
libtpu: 0.0.40
codegen_flags: <defaults>
</compile_context>

<pallas_src>
import functools

import jax
import jax.numpy as jnp
from jax import lax
from jax.experimental import pallas as pl
from jax.experimental.pallas import tpu as pltpu

EPS = 1e-5
LANE = 128
FOLD_K_MAX = 512          # fold all taps into one matmul while K = KH*KW*Cin <= this


def _round_up(x, m):
    return (x + m - 1) // m * m


def _derive_vmem_limit():
    """Generation-aware scoped-VMEM limit (review: don't hard-code 32 MiB)."""
    default = 32 * 1024 * 1024
    try:
        cap = getattr(pltpu.get_tpu_info(), "vmem_capacity_bytes", 0)
        if not cap:
            return default
        # ~3/4 of physical, capped: 64 MiB on v5e/v6e (128 MiB phys), 48 MiB on v7x (64 MiB).
        return int(min(cap * 3 // 4, 64 * 1024 * 1024))
    except Exception:
        return default


VMEM_LIMIT = _derive_vmem_limit()


def _pick_row_block(rows):
    """Large lane-dense row block for the mem-bound BN/ReLU sweep."""
    for rb in (2048, 1024, 512, 256, 128, 64, 32, 16, 8):
        if rows % rb == 0:
            return rb
    return rows


# --------------------------------------------------------------------------- #
# Pass 1: conv (bf16 operands, f32 accum) + per-channel BN statistics.
# --------------------------------------------------------------------------- #
def conv_stats_kernel(x_ref, w_ref, o_ref, stats_ref, *,
                      ksize_h, ksize_w, out_ch, fold_all, m_tile):
    """One grid step = one sample (padded plane) x one cout block.

    x_ref     : (1, Hp, Wp, Cin)  bf16 padded NHWC input, sample n
    w_ref     : (KH*KW*Cin, Ct)   bf16 tap-folded weights, cout block c
    o_ref     : (1, Ho, Wo, out_ch) bf16 un-normalized conv output tile
    stats_ref : (n_cblk, 3, Ct)   f32 resident accumulator: [sum, centered-SS, m*mu^2]
    """
    _, Hp, Wp, Cin = x_ref.shape
    _, Ho, Wo, _ = o_ref.shape
    Ct = w_ref.shape[1]

    n = pl.program_id(0)
    c = pl.program_id(1)

    x = x_ref[0]                                              # (Hp, Wp, Cin) bf16

    if fold_all:
        # Small K: fold all KH*KW taps into one contraction (single MXU matmul).
        parts = [x[kh:kh + Ho, kw:kw + Wo, :]
                 for kh in range(ksize_h) for kw in range(ksize_w)]
        patch = jnp.concatenate(parts, axis=-1).reshape(
            Ho * Wo, ksize_h * ksize_w * Cin)
        acc = jnp.dot(patch, w_ref[...], preferred_element_type=jnp.float32)
    else:
        # Large K: per-kh-row accumulation (K = KW*Cin each) -- never materialize
        # the full 9x im2col patch in VMEM.
        acc = jnp.zeros((Ho * Wo, Ct), jnp.float32)
        for kh in range(ksize_h):
            row = x[kh:kh + Ho]                               # (Ho, Wp, Cin)
            parts = [row[:, kw:kw + Wo, :] for kw in range(ksize_w)]
            patch = jnp.concatenate(parts, axis=-1).reshape(Ho * Wo, ksize_w * Cin)
            w_row = w_ref[kh * ksize_w * Cin:(kh + 1) * ksize_w * Cin, :]
            acc = acc + jnp.dot(patch, w_row, preferred_element_type=jnp.float32)

    # Conv bias intentionally omitted: training-mode BN's mean subtraction cancels
    # any per-channel constant exactly.
    o_ref[...] = acc[:, :out_ch].reshape(1, Ho, Wo, out_ch).astype(o_ref.dtype)

    # Shifted / two-level BN statistics (avoids E[x^2]-E[x]^2 cancellation):
    #   s1  = sum(x),  css = sum((x - mu_tile)^2),  sm2 = m_tile * mu_tile^2
    s1 = jnp.sum(acc, axis=0, keepdims=True)                  # (1, Ct)
    mu = s1 * (1.0 / m_tile)
    d = acc - mu
    css = jnp.sum(d * d, axis=0, keepdims=True)               # (1, Ct)
    sm2 = (mu * mu) * m_tile                                  # (1, Ct)
    contrib = jnp.concatenate([s1, css, sm2], axis=0)         # (3, Ct)

    @pl.when(jnp.logical_and(n == 0, c == 0))                 # very first grid step
    def _init():
        stats_ref[...] = jnp.zeros_like(stats_ref)

    stats_ref[c] = stats_ref[c] + contrib                     # resident accumulator


# --------------------------------------------------------------------------- #
# Pass 2: normalize + affine + ReLU (streaming, large 2-D blocks, writes :Cout).
# --------------------------------------------------------------------------- #
def bn_relu_kernel(y_ref, scale_ref, shift_ref, o_ref, *, out_ch):
    y = y_ref[...].astype(jnp.float32)                        # (rows, Cv)
    z = jnp.maximum(y * scale_ref[...] + shift_ref[...], 0.0)
    o_ref[...] = z[:, :out_ch].astype(o_ref.dtype)


# --------------------------------------------------------------------------- #
# Wrapper (PyTorch NCHW / OIHW conventions at the boundary).
# --------------------------------------------------------------------------- #
@functools.partial(jax.jit, static_argnames=("padding",))
def conv_block_forward(x_nchw, weight, bias, gamma, beta, padding=1):
    """x_nchw: (N, Cin, H, W); weight: (Cout, Cin, KH, KW)."""
    del bias  # cancelled exactly by training-mode BatchNorm mean subtraction
    # TODO(synk): re-add the conv bias if this block is ever evaluated with running
    #             (inference-mode) BN statistics.

    N, Cin, H, W = x_nchw.shape
    Cout, _, KH, KW = weight.shape
    Hp, Wp = H + 2 * padding, W + 2 * padding
    Ho, Wo = Hp - KH + 1, Wp - KW + 1
    K = KH * KW * Cin

    # Lane-dense cout blocking for the MXU N dim; 256-wide blocks when they tile evenly.
    Cp = _round_up(max(Cout, LANE), LANE)
    Ct = 256 if Cp % 256 == 0 else LANE
    n_cblk = Cp // Ct
    # Intermediate channel width: store only :Cout when a single block covers it.
    Cv = Cout if n_cblk == 1 else Cp
    out_ch = Cout if n_cblk == 1 else Ct
    fold_all = K <= FOLD_K_MAX

    # Layout glue (see TODOs at top); bf16 matmul operands, f32 accumulation.
    x_nhwc = jnp.transpose(x_nchw, (0, 2, 3, 1))
    xp = jnp.pad(x_nhwc, ((0, 0), (padding, padding), (padding, padding), (0, 0)))
    xp = xp.astype(jnp.bfloat16)

    # OIHW -> (KH, KW, Cin, Cout) -> fold taps into contraction dim -> pad Cout.
    w_fold = jnp.transpose(weight, (2, 3, 1, 0)).reshape(K, Cout)
    w_fold = jnp.pad(w_fold, ((0, 0), (0, Cp - Cout))).astype(jnp.bfloat16)
    gamma_p = jnp.pad(gamma.astype(jnp.float32), (0, Cp - Cout))
    beta_p = jnp.pad(beta.astype(jnp.float32), (0, Cp - Cout))

    m_tile = float(Ho * Wo)

    # ---------------- pass 1: conv + per-channel statistics ---------------- #
    flops1 = 2 * N * Ho * Wo * K * Cp
    bytes1 = (N * Hp * Wp * Cin * 2) + (N * n_cblk * K * Ct * 2) \
        + (N * Ho * Wo * Cv * 2) + (n_cblk * 3 * Ct * 4)

    conv_out, stats = pl.pallas_call(
        functools.partial(conv_stats_kernel, ksize_h=KH, ksize_w=KW,
                          out_ch=out_ch, fold_all=fold_all, m_tile=m_tile),
        out_shape=(
            jax.ShapeDtypeStruct((N, Ho, Wo, Cv), jnp.bfloat16),
            jax.ShapeDtypeStruct((n_cblk, 3, Ct), jnp.float32),
        ),
        grid_spec=pltpu.PrefetchScalarGridSpec(
            num_scalar_prefetch=0,
            # Batch outer, cout-block inner: x's block index is constant across the
            # inner sweep, so the padded plane is fetched from HBM once per sample.
            grid=(N, n_cblk),
            in_specs=[
                pl.BlockSpec((1, Hp, Wp, Cin), lambda n, c: (n, 0, 0, 0)),
                pl.BlockSpec((K, Ct), lambda n, c: (0, c)),
            ],
            out_specs=[
                pl.BlockSpec((1, Ho, Wo, out_ch), lambda n, c: (n, 0, 0, c)),
                pl.BlockSpec((n_cblk, 3, Ct), lambda n, c: (0, 0, 0)),  # resident
            ],
        ),
        compiler_params=pltpu.CompilerParams(
            # Stats accumulate across both axes -> keep both "arbitrary".
            dimension_semantics=("arbitrary", "arbitrary"),
            vmem_limit_bytes=VMEM_LIMIT),
        cost_estimate=pl.CostEstimate(
            flops=flops1, transcendentals=0, bytes_accessed=bytes1),
    )(xp, w_fold)

    # -------- tiny glue: BN scale/shift from the accumulated statistics -------- #
    M = float(N * Ho * Wo)
    st = jnp.transpose(stats, (1, 0, 2)).reshape(3, Cp)       # (3, Cp)
    mean = st[0] / M
    # var = (sum of centered SS + sum m*mu_t^2)/M - mean^2 ; the cancelling part is
    # only the (small) between-tile component, so precision is preserved.
    var = jnp.maximum((st[1] + st[2]) / M - mean * mean, 0.0)  # biased (BN training)
    inv = lax.rsqrt(var + EPS)
    scale = (gamma_p * inv)[:Cv].reshape(1, Cv)
    shift = (beta_p - mean * gamma_p * inv)[:Cv].reshape(1, Cv)

    # ---------------- pass 2: normalize + affine + ReLU ---------------- #
    R = N * Ho * Wo
    row_blk = _pick_row_block(R)
    conv_flat = conv_out.reshape(R, Cv)                       # contiguous view

    bytes2 = R * Cv * 2 + R * Cout * x_nchw.dtype.itemsize + 2 * Cv * 4
    out_flat = pl.pallas_call(
        functools.partial(bn_relu_kernel, out_ch=Cout),
        out_shape=jax.ShapeDtypeStruct((R, Cout), x_nchw.dtype),
        grid_spec=pltpu.PrefetchScalarGridSpec(
            num_scalar_prefetch=0,
            grid=(R // row_blk,),
            in_specs=[
                pl.BlockSpec((row_blk, Cv), lambda r: (r, 0)),
                pl.BlockSpec((1, Cv), lambda r: (0, 0)),
                pl.BlockSpec((1, Cv), lambda r: (0, 0)),
            ],
            out_specs=pl.BlockSpec((row_blk, Cout), lambda r: (r, 0)),
        ),
        compiler_params=pltpu.CompilerParams(
            dimension_semantics=("parallel",),
            vmem_limit_bytes=VMEM_LIMIT),
        cost_estimate=pl.CostEstimate(
            flops=3 * R * Cv, transcendentals=0, bytes_accessed=bytes2),
    )(conv_flat, scale, shift)

    out_nhwc = out_flat.reshape(N, Ho, Wo, Cout)
    return jnp.transpose(out_nhwc, (0, 3, 1, 2))              # back to NCHW


# --------------------------------------------------------------------------- #
# Pure-JAX reference (matches the PyTorch module, incl. the conv bias).
# --------------------------------------------------------------------------- #
def reference_forward(x_nchw, weight, bias, gamma, beta, padding=1):
    y = lax.conv_general_dilated(
        x_nchw, weight, window_strides=(1, 1),
        padding=((padding, padding), (padding, padding)),
        dimension_numbers=("NCHW", "OIHW", "NCHW"))
    y = y + bias[None, :, None, None]
    mean = jnp.mean(y, axis=(0, 2, 3), keepdims=True)
    var = jnp.mean((y - mean) ** 2, axis=(0, 2, 3), keepdims=True)
    y = (y - mean) * lax.rsqrt(var + EPS)
    y = y * gamma[None, :, None, None] + beta[None, :, None, None]
    return jnp.maximum(y, 0.0)


if __name__ == "__main__":
    # Small, deterministic synthetic setup.
    N, Cin, Cout, H, W = 2, 4, 8, 16, 16
    KH = KW = 3

    key = jax.random.PRNGKey(0)
    kx, kw_, kb, kg, kbt = jax.random.split(key, 5)
    x = jax.random.normal(kx, (N, Cin, H, W), dtype=jnp.float32)
    weight = 0.1 * jax.random.normal(kw_, (Cout, Cin, KH, KW), dtype=jnp.float32)
    bias = 0.05 * jax.random.normal(kb, (Cout,), dtype=jnp.float32)
    gamma = 1.0 + 0.1 * jax.random.normal(kg, (Cout,), dtype=jnp.float32)
    beta = 0.05 * jax.random.normal(kbt, (Cout,), dtype=jnp.float32)

    out = conv_block_forward(x, weight, bias, gamma, beta)
    out = jax.block_until_ready(out)

    ref = reference_forward(x, weight, bias, gamma, beta)
    assert out.shape == (N, Cout, H, W)
    err = float(jnp.max(jnp.abs(out - ref)))
    # bf16 matmul operands + bf16 intermediate (f32 accumulation / stats / affine):
    # tolerance relaxed accordingly vs a pure-f32 pipeline.
    assert jnp.allclose(out, ref, atol=2e-2, rtol=2e-2), f"max abs err = {err}"

    print("KERNEL_OK")
</pallas_src>

<mosaic_0001>
module attributes {stable_mosaic.version = 11 : i64} {
  func.func @conv_stats_kernel(%arg0: i32, %arg1: i32, %arg2: memref<1x18x18x4xbf16, #tpu.memory_space<vmem>>, %arg3: memref<36x128xbf16, #tpu.memory_space<vmem>>, %arg4: memref<1x16x16x8xbf16, #tpu.memory_space<vmem>>, %arg5: memref<1x3x128xf32, #tpu.memory_space<vmem>>) attributes {dimension_semantics = [#tpu.dimension_semantics<arbitrary>, #tpu.dimension_semantics<arbitrary>], iteration_bounds = array<i64: 2, 1>, scalar_prefetch = 0 : i64, scratch_operands = 0 : i64, tpu.core_type = #tpu.core_type<tc>, window_params = [{transform_indices = @transform_0, window_bounds = array<i64: 1, 18, 18, 4>}, {transform_indices = @transform_1, window_bounds = array<i64: 36, 128>}, {transform_indices = @transform_2, window_bounds = array<i64: 1, 16, 16, 8>}, {pipeline_mode = #tpu.pipeline_mode<synchronous>, transform_indices = @transform_3, window_bounds = array<i64: 1, 3, 128>}]} {
    %c0 = arith.constant 0 : index
    %c0_0 = arith.constant 0 : index
    %c0_1 = arith.constant 0 : index
    %c0_2 = arith.constant 0 : index
    %0 = vector.load %arg2[%c0, %c0_0, %c0_1, %c0_2] : memref<1x18x18x4xbf16, #tpu.memory_space<vmem>>, vector<1x18x18x4xbf16>
    %1 = vector.shape_cast %0 : vector<1x18x18x4xbf16> to vector<18x18x4xbf16>
    %2 = vector.extract_strided_slice %1 {offsets = [0, 0, 0], sizes = [16, 16, 4], strides = [1, 1, 1]} : vector<18x18x4xbf16> to vector<16x16x4xbf16>
    %3 = vector.extract_strided_slice %1 {offsets = [0, 1, 0], sizes = [16, 16, 4], strides = [1, 1, 1]} : vector<18x18x4xbf16> to vector<16x16x4xbf16>
    %4 = vector.extract_strided_slice %1 {offsets = [0, 2, 0], sizes = [16, 16, 4], strides = [1, 1, 1]} : vector<18x18x4xbf16> to vector<16x16x4xbf16>
    %5 = vector.extract_strided_slice %1 {offsets = [1, 0, 0], sizes = [16, 16, 4], strides = [1, 1, 1]} : vector<18x18x4xbf16> to vector<16x16x4xbf16>
    %6 = vector.extract_strided_slice %1 {offsets = [1, 1, 0], sizes = [16, 16, 4], strides = [1, 1, 1]} : vector<18x18x4xbf16> to vector<16x16x4xbf16>
    %7 = vector.extract_strided_slice %1 {offsets = [1, 2, 0], sizes = [16, 16, 4], strides = [1, 1, 1]} : vector<18x18x4xbf16> to vector<16x16x4xbf16>
    %8 = vector.extract_strided_slice %1 {offsets = [2, 0, 0], sizes = [16, 16, 4], strides = [1, 1, 1]} : vector<18x18x4xbf16> to vector<16x16x4xbf16>
    %9 = vector.extract_strided_slice %1 {offsets = [2, 1, 0], sizes = [16, 16, 4], strides = [1, 1, 1]} : vector<18x18x4xbf16> to vector<16x16x4xbf16>
    %10 = vector.extract_strided_slice %1 {offsets = [2, 2, 0], sizes = [16, 16, 4], strides = [1, 1, 1]} : vector<18x18x4xbf16> to vector<16x16x4xbf16>
    %11 = tpu.concatenate %2, %3, %4, %5, %6, %7, %8, %9, %10 in 2 : vector<16x16x4xbf16>, vector<16x16x4xbf16>, vector<16x16x4xbf16>, vector<16x16x4xbf16>, vector<16x16x4xbf16>, vector<16x16x4xbf16>, vector<16x16x4xbf16>, vector<16x16x4xbf16>, vector<16x16x4xbf16> -> vector<16x16x36xbf16>
    %12 = vector.shape_cast %11 : vector<16x16x36xbf16> to vector<256x36xbf16>
    %c0_3 = arith.constant 0 : index
    %c0_4 = arith.constant 0 : index
    %13 = vector.load %arg3[%c0_3, %c0_4] : memref<36x128xbf16, #tpu.memory_space<vmem>>, vector<36x128xbf16>
    %cst = arith.constant dense<0.000000e+00> : vector<256x128xf32>
    %14 = tpu.matmul %12, %13, %cst {dimension_numbers = #tpu.dot_dimension_numbers<[1], [0], [0], [1], [0, 0, 1, 1], [], []>} : vector<256x36xbf16>, vector<36x128xbf16>, vector<256x128xf32> -> vector<256x128xf32>
    %15 = vector.extract_strided_slice %14 {offsets = [0, 0], sizes = [256, 8], strides = [1, 1]} : vector<256x128xf32> to vector<256x8xf32>
    %16 = vector.shape_cast %15 : vector<256x8xf32> to vector<1x16x16x8xf32>
    %17 = arith.truncf %16 : vector<1x16x16x8xf32> to vector<1x16x16x8xbf16>
    %c0_5 = arith.constant 0 : index
    %c0_6 = arith.constant 0 : index
    %c0_7 = arith.constant 0 : index
    %c0_8 = arith.constant 0 : index
    %18 = vector.load %arg4[%c0_5, %c0_6, %c0_7, %c0_8] : memref<1x16x16x8xbf16, #tpu.memory_space<vmem>>, vector<1x16x16x8xbf16>
    tpu.vector_store %arg4[%c0_5, %c0_6, %c0_7, %c0_8], %17 {strides = array<i32>} : memref<1x16x16x8xbf16, #tpu.memory_space<vmem>>, vector<1x16x16x8xbf16>,
    %cst_9 = arith.constant dense<0.000000e+00> : vector<128xf32>
    %19 = vector.multi_reduction <add>, %14, %cst_9 [0] : vector<256x128xf32> to vector<128xf32>
    %20 = vector.shape_cast %19 : vector<128xf32> to vector<1x128xf32>
    %cst_10 = arith.constant 3.906250e-03 : f32
    %21 = vector.broadcast %cst_10 : f32 to vector<1x128xf32>
    %22 = arith.mulf %20, %21 : vector<1x128xf32>
    %23 = vector.broadcast %22 : vector<1x128xf32> to vector<256x128xf32>
    %24 = arith.subf %14, %23 : vector<256x128xf32>
    %25 = arith.mulf %24, %24 : vector<256x128xf32>
    %cst_11 = arith.constant dense<0.000000e+00> : vector<128xf32>
    %26 = vector.multi_reduction <add>, %25, %cst_11 [0] : vector<256x128xf32> to vector<128xf32>
    %27 = vector.shape_cast %26 : vector<128xf32> to vector<1x128xf32>
    %28 = arith.mulf %22, %22 : vector<1x128xf32>
    %cst_12 = arith.constant 2.560000e+02 : f32
    %29 = vector.broadcast %cst_12 : f32 to vector<1x128xf32>
    %30 = arith.mulf %28, %29 : vector<1x128xf32>
    %31 = tpu.concatenate %20, %27, %30 in 0 : vector<1x128xf32>, vector<1x128xf32>, vector<1x128xf32> -> vector<3x128xf32>
    %c0_i32 = arith.constant 0 : i32
    %32 = arith.cmpi eq, %arg0, %c0_i32 : i32
    %c0_i32_13 = arith.constant 0 : i32
    %33 = arith.cmpi eq, %arg1, %c0_i32_13 : i32
    %34 = arith.andi %32, %33 : i1
    %35 = arith.extui %34 : i1 to i32
    %c0_i32_14 = arith.constant 0 : i32
    %36 = arith.cmpi ne, %35, %c0_i32_14 : i32
    scf.if %36 {
      %cst_19 = arith.constant 0.000000e+00 : f32
      %45 = vector.broadcast %cst_19 : f32 to vector<1x3x128xf32>
      %c0_20 = arith.constant 0 : index
      %c0_21 = arith.constant 0 : index
      %c0_22 = arith.constant 0 : index
      %46 = vector.load %arg5[%c0_20, %c0_21, %c0_22] : memref<1x3x128xf32, #tpu.memory_space<vmem>>, vector<1x3x128xf32>
      tpu.vector_store %arg5[%c0_20, %c0_21, %c0_22], %45 {strides = array<i32>} : memref<1x3x128xf32, #tpu.memory_space<vmem>>, vector<1x3x128xf32>,
    } else {
    }
    %37 = arith.index_cast %arg1 : i32 to index
    %c0_15 = arith.constant 0 : index
    %c0_16 = arith.constant 0 : index
    %38 = vector.load %arg5[%37, %c0_15, %c0_16] : memref<1x3x128xf32, #tpu.memory_space<vmem>>, vector<1x3x128xf32>
    %39 = vector.shape_cast %38 : vector<1x3x128xf32> to vector<3x128xf32>
    %40 = arith.addf %39, %31 : vector<3x128xf32>
    %41 = arith.index_cast %arg1 : i32 to index
    %c0_17 = arith.constant 0 : index
    %c0_18 = arith.constant 0 : index
    %42 = vector.load %arg5[%41, %c0_17, %c0_18] : memref<1x3x128xf32, #tpu.memory_space<vmem>>, vector<1x3x128xf32>
    %43 = vector.shape_cast %42 : vector<1x3x128xf32> to vector<3x128xf32>
    %44 = vector.shape_cast %40 : vector<3x128xf32> to vector<1x3x128xf32>
    tpu.vector_store %arg5[%41, %c0_17, %c0_18], %44 {strides = array<i32>} : memref<1x3x128xf32, #tpu.memory_space<vmem>>, vector<1x3x128xf32>,
    return
  }
  func.func @transform_0(%arg0: i32, %arg1: i32) -> (i32, i32, i32, i32) {
    %c0_i32 = arith.constant 0 : i32
    %c0_i32_0 = arith.constant 0 : i32
    %c0_i32_1 = arith.constant 0 : i32
    %c0_i32_2 = arith.constant 0 : i32
    return %arg0, %c0_i32, %c0_i32_0, %c0_i32_1 : i32, i32, i32, i32
  }
  func.func @transform_1(%arg0: i32, %arg1: i32) -> (i32, i32) {
    %c0_i32 = arith.constant 0 : i32
    %c0_i32_0 = arith.constant 0 : i32
    return %c0_i32, %arg1 : i32, i32
  }
  func.func @transform_2(%arg0: i32, %arg1: i32) -> (i32, i32, i32, i32) {
    %c0_i32 = arith.constant 0 : i32
    %c0_i32_0 = arith.constant 0 : i32
    %c0_i32_1 = arith.constant 0 : i32
    return %arg0, %c0_i32, %c0_i32_0, %arg1 : i32, i32, i32, i32
  }
  func.func @transform_3(%arg0: i32, %arg1: i32) -> (i32, i32, i32) {
    %c0_i32 = arith.constant 0 : i32
    %c0_i32_0 = arith.constant 0 : i32
    %c0_i32_1 = arith.constant 0 : i32
    %c0_i32_2 = arith.constant 0 : i32
    return %c0_i32, %c0_i32_0, %c0_i32_1 : i32, i32, i32
  }
}

module attributes {stable_mosaic.version = 11 : i64} {
  func.func @bn_relu_kernel(%arg0: i32, %arg1: memref<512x8xbf16, #tpu.memory_space<vmem>>, %arg2: memref<1x8xf32, #tpu.memory_space<vmem>>, %arg3: memref<1x8xf32, #tpu.memory_space<vmem>>, %arg4: memref<512x8xf32, #tpu.memory_space<vmem>>) attributes {dimension_semantics = [#tpu.dimension_semantics<parallel>], iteration_bounds = array<i64: 1>, scalar_prefetch = 0 : i64, scratch_operands = 0 : i64, tpu.core_type = #tpu.core_type<tc>, window_params = [{transform_indices = @transform_0, window_bounds = array<i64: 512, 8>}, {pipeline_mode = #tpu.pipeline_mode<synchronous>, transform_indices = @transform_1, window_bounds = array<i64: 1, 8>}, {pipeline_mode = #tpu.pipeline_mode<synchronous>, transform_indices = @transform_2, window_bounds = array<i64: 1, 8>}, {transform_indices = @transform_3, window_bounds = array<i64: 512, 8>}]} {
    %c0 = arith.constant 0 : index
    %c0_0 = arith.constant 0 : index
    %0 = vector.load %arg1[%c0, %c0_0] : memref<512x8xbf16, #tpu.memory_space<vmem>>, vector<512x8xbf16>
    %1 = arith.extf %0 : vector<512x8xbf16> to vector<512x8xf32>
    %c0_1 = arith.constant 0 : index
    %c0_2 = arith.constant 0 : index
    %2 = vector.load %arg2[%c0_1, %c0_2] : memref<1x8xf32, #tpu.memory_space<vmem>>, vector<1x8xf32>
    %3 = vector.broadcast %2 : vector<1x8xf32> to vector<512x8xf32>
    %4 = arith.mulf %1, %3 : vector<512x8xf32>
    %c0_3 = arith.constant 0 : index
    %c0_4 = arith.constant 0 : index
    %5 = vector.load %arg3[%c0_3, %c0_4] : memref<1x8xf32, #tpu.memory_space<vmem>>, vector<1x8xf32>
    %6 = vector.broadcast %5 : vector<1x8xf32> to vector<512x8xf32>
    %7 = arith.addf %4, %6 : vector<512x8xf32>
    %cst = arith.constant 0.000000e+00 : f32
    %8 = vector.broadcast %cst : f32 to vector<512x8xf32>
    %9 = arith.maximumf %7, %8 : vector<512x8xf32>
    %c0_5 = arith.constant 0 : index
    %c0_6 = arith.constant 0 : index
    %10 = vector.load %arg4[%c0_5, %c0_6] : memref<512x8xf32, #tpu.memory_space<vmem>>, vector<512x8xf32>
    tpu.vector_store %arg4[%c0_5, %c0_6], %9 {strides = array<i32>} : memref<512x8xf32, #tpu.memory_space<vmem>>, vector<512x8xf32>,
    return
  }
  func.func @transform_0(%arg0: i32) -> (i32, i32) {
    %c0_i32 = arith.constant 0 : i32
    %c0_i32_0 = arith.constant 0 : i32
    return %arg0, %c0_i32 : i32, i32
  }
  func.func @transform_1(%arg0: i32) -> (i32, i32) {
    %c0_i32 = arith.constant 0 : i32
    %c0_i32_0 = arith.constant 0 : i32
    %c0_i32_1 = arith.constant 0 : i32
    return %c0_i32, %c0_i32_0 : i32, i32
  }
  func.func @transform_2(%arg0: i32) -> (i32, i32) {
    %c0_i32 = arith.constant 0 : i32
    %c0_i32_0 = arith.constant 0 : i32
    %c0_i32_1 = arith.constant 0 : i32
    return %c0_i32, %c0_i32_0 : i32, i32
  }
  func.func @transform_3(%arg0: i32) -> (i32, i32) {
    %c0_i32 = arith.constant 0 : i32
    %c0_i32_0 = arith.constant 0 : i32
    return %arg0, %c0_i32 : i32, i32
  }
}

</mosaic_0001>

<bundles_post_ra>
// kernel: conv_block_forward.3
= control target key start
LH: loop header
LB: loop body
LE: loop exit
PB: predicated region body
PF: predicated region fallthrough
CT: control target
= control target key end

     0   :  { %vm342_vm0 = vcmask 64512   ;;  %s1082_s0 = inlined_call_operand.vmem [shape: bf16[512,8], index: 0, kind: input, shape index: {}]   ;;  %s1083_s1 = inlined_call_operand.vmem [shape: f32[1,8], index: 1, kind: input, shape index: {}]   ;;  %s1084_s2 = inlined_call_operand.vmem [shape: f32[1,8], index: 2, kind: input, shape index: {}]   ;;  %s1085_s3 = inlined_call_operand.vmem [shape: f32[512,8], index: 3, kind: output, shape index: {}]  }
   0x1   :  { %v412_v0 = vld [vmem:[%s1082_s0] sm:$0xff]   ;;  %v539_v5 = vld [vmem:[%s1082_s0 + $0x8] sm:$0xff]   ;;  %v540_v8 = vld [vmem:[%s1082_s0 + $0x10] sm:$0xff]  }
   0x2   :  { %v598_v1 = vld [vmem:[%s1083_s1] ss:$0 sm:$0xff]  ;;  %v413_v2 = vunpack.c.l.bf16 %v412_v0  ;;  %v414_v4 = vunpack.c.h.bf16 %v412_v0  ;;  %v417_v6 = vunpack.c.l.bf16 %v539_v5  ;;  %v418_v7 = vunpack.c.h.bf16 %v539_v5  ;;  %v541_v9 = vld [vmem:[%s1082_s0 + $0x18] sm:$0xff]   ;;  %v543_v31 = vld [vmem:[%s1082_s0 + $0x28] sm:$0xff]  }
   0x3   :  { %v603_v3 = vld [vmem:[%s1084_s2] ss:$0 sm:$0xff]  ;;  %v421_v12 = vunpack.c.l.bf16 %v540_v8  ;;  %v422_v13 = vunpack.c.h.bf16 %v540_v8  ;;  %v425_v16 = vunpack.c.l.bf16 %v541_v9  ;;  %v426_v17 = vunpack.c.h.bf16 %v541_v9  ;;  %v544_v36 = vld [vmem:[%s1082_s0 + $0x30] sm:$0xff]   ;;  %v545_v41 = vld [vmem:[%s1082_s0 + $0x38] sm:$0xff]  }
   0x4   :  { %v146_v10 = vmul.f32 %v598_v1, %v413_v2  ;;  %v147_v11 = vmul.f32 %v598_v1, %v414_v4  ;;  %v148_v14 = vmul.f32 %v598_v1, %v417_v6  ;;  %v149_v15 = vmul.f32 %v598_v1, %v418_v7  ;;  %v542_v26 = vld [vmem:[%s1082_s0 + $0x20] sm:$0xff]   ;;  %v547_v5 = vld [vmem:[%s1082_s0 + $0x48] sm:$0xff]  }
   0x5   :  { %v150_v20 = vmul.f32 %v598_v1, %v421_v12  ;;  %v151_v21 = vmul.f32 %v598_v1, %v422_v13  ;;  %v152_v24 = vmul.f32 %v598_v1, %v425_v16  ;;  %v153_v25 = vmul.f32 %v598_v1, %v426_v17  ;;  %v546_v62 = vld [vmem:[%s1082_s0 + $0x40] sm:$0xff]  }
   0x6   :  { %v214_v18 = vadd.f32 %v603_v3, %v146_v10  ;;  %v215_v19 = vadd.f32 %v603_v3, %v147_v11  ;;  %v216_v22 = vadd.f32 %v603_v3, %v148_v14  ;;  %v217_v23 = vadd.f32 %v603_v3, %v149_v15  ;;  %v548_v10 = vld [vmem:[%s1082_s0 + $0x50] sm:$0xff]   ;;  %v549_v15 = vld [vmem:[%s1082_s0 + $0x58] sm:$0xff]  }
   0x7   :  { %v218_v29 = vadd.f32 %v603_v3, %v150_v20  ;;  %v219_v30 = vadd.f32 %v603_v3, %v151_v21  ;;  %v220_v34 = vadd.f32 %v603_v3, %v152_v24  ;;  %v221_v35 = vadd.f32 %v603_v3, %v153_v25 }
   0x8   :  { %v278_v27 = vmax.f32 %v214_v18, 0.0  ;;  %v279_v28 = vmax.f32 %v215_v19, 0.0  ;;  %v280_v32 = vmax.f32 %v216_v22, 0.0  ;;  %v281_v33 = vmax.f32 %v217_v23, 0.0 }
   0x9   :  { %v282_v37 = vmax.f32 %v218_v29, 0.0  ;;  %v283_v38 = vmax.f32 %v219_v30, 0.0  ;;  %v429_v39 = vunpack.c.l.bf16 %v542_v26  ;;  %v430_v40 = vunpack.c.h.bf16 %v542_v26 }
   0xa   :  { %343 = vst.msk [vmem:[%s1085_s3] sm:$0xff] %vm342_vm0, %v278_v27  ;;  %v284_v42 = vmax.f32 %v220_v34, 0.0  ;;  %v285_v43 = vmax.f32 %v221_v35, 0.0  ;;  %v433_v44 = vunpack.c.l.bf16 %v543_v31  ;;  %v434_v45 = vunpack.c.h.bf16 %v543_v31 }
   0xb   :  { %344 = vst.msk [vmem:[%s1085_s3 + $0x8] sm:$0xff] %vm342_vm0, %v279_v28  ;;  %v154_v46 = vmul.f32 %v598_v1, %v429_v39  ;;  %v155_v47 = vmul.f32 %v598_v1, %v430_v40  ;;  %v437_v48 = vunpack.c.l.bf16 %v544_v36  ;;  %v438_v49 = vunpack.c.h.bf16 %v544_v36  ;;  %v550_v36 = vld [vmem:[%s1082_s0 + $0x60] sm:$0xff]  }
   0xc   :  { %345 = vst.msk [vmem:[%s1085_s3 + $0x10] sm:$0xff] %vm342_vm0, %v280_v32  ;;  %v156_v50 = vmul.f32 %v598_v1, %v433_v44  ;;  %v157_v51 = vmul.f32 %v598_v1, %v434_v45  ;;  %v441_v52 = vunpack.c.l.bf16 %v545_v41  ;;  %v442_v53 = vunpack.c.h.bf16 %v545_v41  ;;  %v551_v41 = vld [vmem:[%s1082_s0 + $0x68] sm:$0xff]  }
   0xd   :  { %346 = vst.msk [vmem:[%s1085_s3 + $0x18] sm:$0xff] %vm342_vm0, %v281_v33  ;;  %v222_v54 = vadd.f32 %v603_v3, %v154_v46  ;;  %v223_v55 = vadd.f32 %v603_v3, %v155_v47  ;;  %v158_v56 = vmul.f32 %v598_v1, %v437_v48  ;;  %v159_v57 = vmul.f32 %v598_v1, %v438_v49  ;;  %v552_v46 = vld [vmem:[%s1082_s0 + $0x70] sm:$0xff]  }
   0xe   :  { %347 = vst.msk [vmem:[%s1085_s3 + $0x20] sm:$0xff] %vm342_vm0, %v282_v37  ;;  %v224_v58 = vadd.f32 %v603_v3, %v156_v50  ;;  %v225_v59 = vadd.f32 %v603_v3, %v157_v51  ;;  %v160_v60 = vmul.f32 %v598_v1, %v441_v52  ;;  %v161_v61 = vmul.f32 %v598_v1, %v442_v53  ;;  %v553_v51 = vld [vmem:[%s1082_s0 + $0x78] sm:$0xff]  }
   0xf   :  { %348 = vst.msk [vmem:[%s1085_s3 + $0x28] sm:$0xff] %vm342_vm0, %v283_v38  ;;  %v286_v63 = vmax.f32 %v222_v54, 0.0  ;;  %v287_v0 = vmax.f32 %v223_v55, 0.0  ;;  %v226_v2 = vadd.f32 %v603_v3, %v158_v56  ;;  %v227_v4 = vadd.f32 %v603_v3, %v159_v57 }
  0x10   :  { %349 = vst.msk [vmem:[%s1085_s3 + $0x30] sm:$0xff] %vm342_vm0, %v284_v42  ;;  %v288_v6 = vmax.f32 %v224_v58, 0.0  ;;  %v289_v7 = vmax.f32 %v225_v59, 0.0  ;;  %v228_v8 = vadd.f32 %v603_v3, %v160_v60  ;;  %v229_v9 = vadd.f32 %v603_v3, %v161_v61 }
  0x11   :  { %350 = vst.msk [vmem:[%s1085_s3 + $0x38] sm:$0xff] %vm342_vm0, %v285_v43  ;;  %v290_v11 = vmax.f32 %v226_v2, 0.0  ;;  %v291_v12 = vmax.f32 %v227_v4, 0.0  ;;  %v445_v13 = vunpack.c.l.bf16 %v546_v62  ;;  %v446_v14 = vunpack.c.h.bf16 %v546_v62 }
  0x12   :  { %351 = vst.msk [vmem:[%s1085_s3 + $0x40] sm:$0xff] %vm342_vm0, %v286_v63  ;;  %v292_v16 = vmax.f32 %v228_v8, 0.0  ;;  %v293_v17 = vmax.f32 %v229_v9, 0.0  ;;  %v449_v18 = vunpack.c.l.bf16 %v547_v5  ;;  %v450_v19 = vunpack.c.h.bf16 %v547_v5 }
  0x13   :  { %352 = vst.msk [vmem:[%s1085_s3 + $0x48] sm:$0xff] %vm342_vm0, %v287_v0  ;;  %v162_v20 = vmul.f32 %v598_v1, %v445_v13  ;;  %v163_v21 = vmul.f32 %v598_v1, %v446_v14  ;;  %v453_v22 = vunpack.c.l.bf16 %v548_v10  ;;  %v454_v23 = vunpack.c.h.bf16 %v548_v10  ;;  %v554_v10 = vld [vmem:[%s1082_s0 + $0x80] sm:$0xff]  }
  0x14   :  { %353 = vst.msk [vmem:[%s1085_s3 + $0x50] sm:$0xff] %vm342_vm0, %v288_v6  ;;  %v164_v24 = vmul.f32 %v598_v1, %v449_v18  ;;  %v165_v25 = vmul.f32 %v598_v1, %v450_v19  ;;  %v457_v26 = vunpack.c.l.bf16 %v549_v15  ;;  %v458_v27 = vunpack.c.h.bf16 %v549_v15  ;;  %v555_v15 = vld [vmem:[%s1082_s0 + $0x88] sm:$0xff]  }
  0x15   :  { %354 = vst.msk [vmem:[%s1085_s3 + $0x58] sm:$0xff] %vm342_vm0, %v289_v7  ;;  %v230_v28 = vadd.f32 %v603_v3, %v162_v20  ;;  %v231_v29 = vadd.f32 %v603_v3, %v163_v21  ;;  %v166_v30 = vmul.f32 %v598_v1, %v453_v22  ;;  %v167_v31 = vmul.f32 %v598_v1, %v454_v23  ;;  %v556_v20 = vld [vmem:[%s1082_s0 + $0x90] sm:$0xff]  }
  0x16   :  { %355 = vst.msk [vmem:[%s1085_s3 + $0x60] sm:$0xff] %vm342_vm0, %v290_v11  ;;  %v232_v32 = vadd.f32 %v603_v3, %v164_v24  ;;  %v233_v33 = vadd.f32 %v603_v3, %v165_v25  ;;  %v168_v34 = vmul.f32 %v598_v1, %v457_v26  ;;  %v169_v35 = vmul.f32 %v598_v1, %v458_v27  ;;  %v557_v25 = vld [vmem:[%s1082_s0 + $0x98] sm:$0xff]  }
  0x17   :  { %356 = vst.msk [vmem:[%s1085_s3 + $0x68] sm:$0xff] %vm342_vm0, %v291_v12  ;;  %v294_v37 = vmax.f32 %v230_v28, 0.0  ;;  %v295_v38 = vmax.f32 %v231_v29, 0.0  ;;  %v234_v39 = vadd.f32 %v603_v3, %v166_v30  ;;  %v235_v40 = vadd.f32 %v603_v3, %v167_v31 }
  0x18   :  { %357 = vst.msk [vmem:[%s1085_s3 + $0x70] sm:$0xff] %vm342_vm0, %v292_v16  ;;  %v296_v42 = vmax.f32 %v232_v32, 0.0  ;;  %v297_v43 = vmax.f32 %v233_v33, 0.0  ;;  %v236_v44 = vadd.f32 %v603_v3, %v168_v34  ;;  %v237_v45 = vadd.f32 %v603_v3, %v169_v35 }
  0x19   :  { %358 = vst.msk [vmem:[%s1085_s3 + $0x78] sm:$0xff] %vm342_vm0, %v293_v17  ;;  %v298_v47 = vmax.f32 %v234_v39, 0.0  ;;  %v299_v48 = vmax.f32 %v235_v40, 0.0  ;;  %v461_v49 = vunpack.c.l.bf16 %v550_v36  ;;  %v462_v50 = vunpack.c.h.bf16 %v550_v36 }
  0x1a   :  { %359 = vst.msk [vmem:[%s1085_s3 + $0x80] sm:$0xff] %vm342_vm0, %v294_v37  ;;  %v300_v52 = vmax.f32 %v236_v44, 0.0  ;;  %v301_v53 = vmax.f32 %v237_v45, 0.0  ;;  %v465_v54 = vunpack.c.l.bf16 %v551_v41  ;;  %v466_v55 = vunpack.c.h.bf16 %v551_v41 }
  0x1b   :  { %360 = vst.msk [vmem:[%s1085_s3 + $0x88] sm:$0xff] %vm342_vm0, %v295_v38  ;;  %v170_v56 = vmul.f32 %v598_v1, %v461_v49  ;;  %v171_v57 = vmul.f32 %v598_v1, %v462_v50  ;;  %v469_v58 = vunpack.c.l.bf16 %v552_v46  ;;  %v470_v59 = vunpack.c.h.bf16 %v552_v46  ;;  %v558_v46 = vld [vmem:[%s1082_s0 + $0xa0] sm:$0xff]  }
  0x1c   :  { %361 = vst.msk [vmem:[%s1085_s3 + $0x90] sm:$0xff] %vm342_vm0, %v296_v42  ;;  %v172_v60 = vmul.f32 %v598_v1, %v465_v54  ;;  %v173_v61 = vmul.f32 %v598_v1, %v466_v55  ;;  %v473_v62 = vunpack.c.l.bf16 %v553_v51  ;;  %v474_v63 = vunpack.c.h.bf16 %v553_v51  ;;  %v559_v51 = vld [vmem:[%s1082_s0 + $0xa8] sm:$0xff]  }
  0x1d   :  { %362 = vst.msk [vmem:[%s1085_s3 + $0x98] sm:$0xff] %vm342_vm0, %v297_v43  ;;  %v238_v0 = vadd.f32 %v603_v3, %v170_v56  ;;  %v239_v2 = vadd.f32 %v603_v3, %v171_v57  ;;  %v174_v4 = vmul.f32 %v598_v1, %v469_v58  ;;  %v175_v5 = vmul.f32 %v598_v1, %v470_v59  ;;  %v560_v56 = vld [vmem:[%s1082_s0 + $0xb0] sm:$0xff]  }
  0x1e   :  { %363 = vst.msk [vmem:[%s1085_s3 + $0xa0] sm:$0xff] %vm342_vm0, %v298_v47  ;;  %v240_v6 = vadd.f32 %v603_v3, %v172_v60  ;;  %v241_v7 = vadd.f32 %v603_v3, %v173_v61  ;;  %v176_v8 = vmul.f32 %v598_v1, %v473_v62  ;;  %v177_v9 = vmul.f32 %v598_v1, %v474_v63  ;;  %v561_v61 = vld [vmem:[%s1082_s0 + $0xb8] sm:$0xff]  }
  0x1f   :  { %364 = vst.msk [vmem:[%s1085_s3 + $0xa8] sm:$0xff] %vm342_vm0, %v299_v48  ;;  %v302_v11 = vmax.f32 %v238_v0, 0.0  ;;  %v303_v12 = vmax.f32 %v239_v2, 0.0  ;;  %v242_v13 = vadd.f32 %v603_v3, %v174_v4  ;;  %v243_v14 = vadd.f32 %v603_v3, %v175_v5 }
  0x20   :  { %365 = vst.msk [vmem:[%s1085_s3 + $0xb0] sm:$0xff] %vm342_vm0, %v300_v52  ;;  %v304_v16 = vmax.f32 %v240_v6, 0.0  ;;  %v305_v17 = vmax.f32 %v241_v7, 0.0  ;;  %v244_v18 = vadd.f32 %v603_v3, %v176_v8  ;;  %v245_v19 = vadd.f32 %v603_v3, %v177_v9 }
  0x21   :  { %366 = vst.msk [vmem:[%s1085_s3 + $0xb8] sm:$0xff] %vm342_vm0, %v301_v53  ;;  %v306_v21 = vmax.f32 %v242_v13, 0.0  ;;  %v307_v22 = vmax.f32 %v243_v14, 0.0  ;;  %v477_v23 = vunpack.c.l.bf16 %v554_v10  ;;  %v478_v24 = vunpack.c.h.bf16 %v554_v10 }
  0x22   :  { %367 = vst.msk [vmem:[%s1085_s3 + $0xc0] sm:$0xff] %vm342_vm0, %v302_v11  ;;  %v308_v26 = vmax.f32 %v244_v18, 0.0  ;;  %v309_v27 = vmax.f32 %v245_v19, 0.0  ;;  %v481_v28 = vunpack.c.l.bf16 %v555_v15  ;;  %v482_v29 = vunpack.c.h.bf16 %v555_v15 }
  0x23   :  { %368 = vst.msk [vmem:[%s1085_s3 + $0xc8] sm:$0xff] %vm342_vm0, %v303_v12  ;;  %v178_v30 = vmul.f32 %v598_v1, %v477_v23  ;;  %v179_v31 = vmul.f32 %v598_v1, %v478_v24  ;;  %v485_v32 = vunpack.c.l.bf16 %v556_v20  ;;  %v486_v33 = vunpack.c.h.bf16 %v556_v20  ;;  %v562_v20 = vld [vmem:[%s1082_s0 + $0xc0] sm:$0xff]  }
  0x24   :  { %369 = vst.msk [vmem:[%s1085_s3 + $0xd0] sm:$0xff] %vm342_vm0, %v304_v16  ;;  %v180_v34 = vmul.f32 %v598_v1, %v481_v28  ;;  %v181_v35 = vmul.f32 %v598_v1, %v482_v29  ;;  %v489_v36 = vunpack.c.l.bf16 %v557_v25  ;;  %v490_v37 = vunpack.c.h.bf16 %v557_v25  ;;  %v563_v25 = vld [vmem:[%s1082_s0 + $0xc8] sm:$0xff]  }
  0x25   :  { %370 = vst.msk [vmem:[%s1085_s3 + $0xd8] sm:$0xff] %vm342_vm0, %v305_v17  ;;  %v246_v38 = vadd.f32 %v603_v3, %v178_v30  ;;  %v247_v39 = vadd.f32 %v603_v3, %v179_v31  ;;  %v182_v40 = vmul.f32 %v598_v1, %v485_v32  ;;  %v183_v41 = vmul.f32 %v598_v1, %v486_v33  ;;  %v564_v30 = vld [vmem:[%s1082_s0 + $0xd0] sm:$0xff]  }
  0x26   :  { %371 = vst.msk [vmem:[%s1085_s3 + $0xe0] sm:$0xff] %vm342_vm0, %v306_v21  ;;  %v248_v42 = vadd.f32 %v603_v3, %v180_v34  ;;  %v249_v43 = vadd.f32 %v603_v3, %v181_v35  ;;  %v184_v44 = vmul.f32 %v598_v1, %v489_v36  ;;  %v185_v45 = vmul.f32 %v598_v1, %v490_v37  ;;  %v565_v35 = vld [vmem:[%s1082_s0 + $0xd8] sm:$0xff]  }
  0x27   :  { %372 = vst.msk [vmem:[%s1085_s3 + $0xe8] sm:$0xff] %vm342_vm0, %v307_v22  ;;  %v310_v47 = vmax.f32 %v246_v38, 0.0  ;;  %v311_v48 = vmax.f32 %v247_v39, 0.0  ;;  %v250_v49 = vadd.f32 %v603_v3, %v182_v40  ;;  %v251_v50 = vadd.f32 %v603_v3, %v183_v41 }
  0x28   :  { %373 = vst.msk [vmem:[%s1085_s3 + $0xf0] sm:$0xff] %vm342_vm0, %v308_v26  ;;  %v312_v52 = vmax.f32 %v248_v42, 0.0  ;;  %v313_v53 = vmax.f32 %v249_v43, 0.0  ;;  %v252_v54 = vadd.f32 %v603_v3, %v184_v44  ;;  %v253_v55 = vadd.f32 %v603_v3, %v185_v45 }
  0x29   :  { %374 = vst.msk [vmem:[%s1085_s3 + $0xf8] sm:$0xff] %vm342_vm0, %v309_v27  ;;  %v314_v57 = vmax.f32 %v250_v49, 0.0  ;;  %v315_v58 = vmax.f32 %v251_v50, 0.0  ;;  %v493_v59 = vunpack.c.l.bf16 %v558_v46  ;;  %v494_v60 = vunpack.c.h.bf16 %v558_v46 }
  0x2a   :  { %375 = vst.msk [vmem:[%s1085_s3 + $0x100] sm:$0xff] %vm342_vm0, %v310_v47  ;;  %v316_v62 = vmax.f32 %v252_v54, 0.0  ;;  %v317_v63 = vmax.f32 %v253_v55, 0.0  ;;  %v497_v0 = vunpack.c.l.bf16 %v559_v51  ;;  %v498_v2 = vunpack.c.h.bf16 %v559_v51 }
  0x2b   :  { %376 = vst.msk [vmem:[%s1085_s3 + $0x108] sm:$0xff] %vm342_vm0, %v311_v48  ;;  %v186_v4 = vmul.f32 %v598_v1, %v493_v59  ;;  %v187_v5 = vmul.f32 %v598_v1, %v494_v60  ;;  %v501_v6 = vunpack.c.l.bf16 %v560_v56  ;;  %v502_v7 = vunpack.c.h.bf16 %v560_v56  ;;  %v566_v56 = vld [vmem:[%s1082_s0 + $0xe0] sm:$0xff]  }
  0x2c   :  { %377 = vst.msk [vmem:[%s1085_s3 + $0x110] sm:$0xff] %vm342_vm0, %v312_v52  ;;  %v188_v8 = vmul.f32 %v598_v1, %v497_v0  ;;  %v189_v9 = vmul.f32 %v598_v1, %v498_v2  ;;  %v505_v10 = vunpack.c.l.bf16 %v561_v61  ;;  %v506_v11 = vunpack.c.h.bf16 %v561_v61  ;;  %v567_v61 = vld [vmem:[%s1082_s0 + $0xe8] sm:$0xff]  }
  0x2d   :  { %378 = vst.msk [vmem:[%s1085_s3 + $0x118] sm:$0xff] %vm342_vm0, %v313_v53  ;;  %v254_v12 = vadd.f32 %v603_v3, %v186_v4  ;;  %v255_v13 = vadd.f32 %v603_v3, %v187_v5  ;;  %v190_v14 = vmul.f32 %v598_v1, %v501_v6  ;;  %v191_v15 = vmul.f32 %v598_v1, %v502_v7  ;;  %v568_v4 = vld [vmem:[%s1082_s0 + $0xf0] sm:$0xff]  }
  0x2e   :  { %379 = vst.msk [vmem:[%s1085_s3 + $0x120] sm:$0xff] %vm342_vm0, %v314_v57  ;;  %v256_v16 = vadd.f32 %v603_v3, %v188_v8  ;;  %v257_v17 = vadd.f32 %v603_v3, %v189_v9  ;;  %v192_v18 = vmul.f32 %v598_v1, %v505_v10  ;;  %v193_v19 = vmul.f32 %v598_v1, %v506_v11  ;;  %v569_v9 = vld [vmem:[%s1082_s0 + $0xf8] sm:$0xff]  }
  0x2f   :  { %380 = vst.msk [vmem:[%s1085_s3 + $0x128] sm:$0xff] %vm342_vm0, %v315_v58  ;;  %v318_v21 = vmax.f32 %v254_v12, 0.0  ;;  %v319_v22 = vmax.f32 %v255_v13, 0.0  ;;  %v258_v23 = vadd.f32 %v603_v3, %v190_v14  ;;  %v259_v24 = vadd.f32 %v603_v3, %v191_v15 }
  0x30   :  { %381 = vst.msk [vmem:[%s1085_s3 + $0x130] sm:$0xff] %vm342_vm0, %v316_v62  ;;  %v320_v26 = vmax.f32 %v256_v16, 0.0  ;;  %v321_v27 = vmax.f32 %v257_v17, 0.0  ;;  %v260_v28 = vadd.f32 %v603_v3, %v192_v18  ;;  %v261_v29 = vadd.f32 %v603_v3, %v193_v19 }
  0x31   :  { %382 = vst.msk [vmem:[%s1085_s3 + $0x138] sm:$0xff] %vm342_vm0, %v317_v63  ;;  %v322_v31 = vmax.f32 %v258_v23, 0.0  ;;  %v323_v32 = vmax.f32 %v259_v24, 0.0  ;;  %v509_v33 = vunpack.c.l.bf16 %v562_v20  ;;  %v510_v34 = vunpack.c.h.bf16 %v562_v20 }
  0x32   :  { %383 = vst.msk [vmem:[%s1085_s3 + $0x140] sm:$0xff] %vm342_vm0, %v318_v21  ;;  %v324_v36 = vmax.f32 %v260_v28, 0.0  ;;  %v325_v37 = vmax.f32 %v261_v29, 0.0  ;;  %v513_v38 = vunpack.c.l.bf16 %v563_v25  ;;  %v514_v39 = vunpack.c.h.bf16 %v563_v25 }
  0x33   :  { %384 = vst.msk [vmem:[%s1085_s3 + $0x148] sm:$0xff] %vm342_vm0, %v319_v22  ;;  %v194_v40 = vmul.f32 %v598_v1, %v509_v33  ;;  %v195_v41 = vmul.f32 %v598_v1, %v510_v34  ;;  %v517_v42 = vunpack.c.l.bf16 %v564_v30  ;;  %v518_v43 = vunpack.c.h.bf16 %v564_v30 }
  0x34   :  { %385 = vst.msk [vmem:[%s1085_s3 + $0x150] sm:$0xff] %vm342_vm0, %v320_v26  ;;  %v196_v44 = vmul.f32 %v598_v1, %v513_v38  ;;  %v197_v45 = vmul.f32 %v598_v1, %v514_v39  ;;  %v521_v46 = vunpack.c.l.bf16 %v565_v35  ;;  %v522_v47 = vunpack.c.h.bf16 %v565_v35 }
  0x35   :  { %386 = vst.msk [vmem:[%s1085_s3 + $0x158] sm:$0xff] %vm342_vm0, %v321_v27  ;;  %v262_v48 = vadd.f32 %v603_v3, %v194_v40  ;;  %v263_v49 = vadd.f32 %v603_v3, %v195_v41  ;;  %v198_v50 = vmul.f32 %v598_v1, %v517_v42  ;;  %v199_v51 = vmul.f32 %v598_v1, %v518_v43 }
  0x36   :  { %387 = vst.msk [vmem:[%s1085_s3 + $0x160] sm:$0xff] %vm342_vm0, %v322_v31  ;;  %v264_v52 = vadd.f32 %v603_v3, %v196_v44  ;;  %v265_v53 = vadd.f32 %v603_v3, %v197_v45  ;;  %v200_v54 = vmul.f32 %v598_v1, %v521_v46  ;;  %v201_v55 = vmul.f32 %v598_v1, %v522_v47 }
  0x37   :  { %388 = vst.msk [vmem:[%s1085_s3 + $0x168] sm:$0xff] %vm342_vm0, %v323_v32  ;;  %v326_v57 = vmax.f32 %v262_v48, 0.0  ;;  %v327_v58 = vmax.f32 %v263_v49, 0.0  ;;  %v266_v59 = vadd.f32 %v603_v3, %v198_v50  ;;  %v267_v60 = vadd.f32 %v603_v3, %v199_v51 }
  0x38   :  { %389 = vst.msk [vmem:[%s1085_s3 + $0x170] sm:$0xff] %vm342_vm0, %v324_v36  ;;  %v328_v62 = vmax.f32 %v264_v52, 0.0  ;;  %v329_v63 = vmax.f32 %v265_v53, 0.0  ;;  %v268_v0 = vadd.f32 %v603_v3, %v200_v54  ;;  %v269_v2 = vadd.f32 %v603_v3, %v201_v55 }
  0x39   :  { %390 = vst.msk [vmem:[%s1085_s3 + $0x178] sm:$0xff] %vm342_vm0, %v325_v37  ;;  %v330_v5 = vmax.f32 %v266_v59, 0.0  ;;  %v331_v6 = vmax.f32 %v267_v60, 0.0  ;;  %v525_v7 = vunpack.c.l.bf16 %v566_v56  ;;  %v526_v8 = vunpack.c.h.bf16 %v566_v56 }
  0x3a   :  { %391 = vst.msk [vmem:[%s1085_s3 + $0x180] sm:$0xff] %vm342_vm0, %v326_v57  ;;  %v332_v10 = vmax.f32 %v268_v0, 0.0  ;;  %v333_v11 = vmax.f32 %v269_v2, 0.0  ;;  %v529_v12 = vunpack.c.l.bf16 %v567_v61  ;;  %v530_v13 = vunpack.c.h.bf16 %v567_v61 }
  0x3b   :  { %392 = vst.msk [vmem:[%s1085_s3 + $0x188] sm:$0xff] %vm342_vm0, %v327_v58  ;;  %v202_v14 = vmul.f32 %v598_v1, %v525_v7  ;;  %v203_v15 = vmul.f32 %v598_v1, %v526_v8  ;;  %v533_v16 = vunpack.c.l.bf16 %v568_v4  ;;  %v534_v17 = vunpack.c.h.bf16 %v568_v4 }
  0x3c   :  { %393 = vst.msk [vmem:[%s1085_s3 + $0x190] sm:$0xff] %vm342_vm0, %v328_v62  ;;  %v204_v18 = vmul.f32 %v598_v1, %v529_v12  ;;  %v205_v19 = vmul.f32 %v598_v1, %v530_v13  ;;  %v537_v20 = vunpack.c.l.bf16 %v569_v9  ;;  %v538_v21 = vunpack.c.h.bf16 %v569_v9 }
  0x3d   :  { %394 = vst.msk [vmem:[%s1085_s3 + $0x198] sm:$0xff] %vm342_vm0, %v329_v63  ;;  %v270_v22 = vadd.f32 %v603_v3, %v202_v14  ;;  %v271_v23 = vadd.f32 %v603_v3, %v203_v15  ;;  %v206_v24 = vmul.f32 %v598_v1, %v533_v16  ;;  %v207_v25 = vmul.f32 %v598_v1, %v534_v17 }
  0x3e   :  { %395 = vst.msk [vmem:[%s1085_s3 + $0x1a0] sm:$0xff] %vm342_vm0, %v330_v5  ;;  %v272_v26 = vadd.f32 %v603_v3, %v204_v18  ;;  %v273_v27 = vadd.f32 %v603_v3, %v205_v19  ;;  %v208_v28 = vmul.f32 %v598_v1, %v537_v20  ;;  %v209_v29 = vmul.f32 %v598_v1, %v538_v21 }
  0x3f   :  { %396 = vst.msk [vmem:[%s1085_s3 + $0x1a8] sm:$0xff] %vm342_vm0, %v331_v6  ;;  %v334_v30 = vmax.f32 %v270_v22, 0.0  ;;  %v335_v31 = vmax.f32 %v271_v23, 0.0  ;;  %v274_v32 = vadd.f32 %v603_v3, %v206_v24  ;;  %v275_v33 = vadd.f32 %v603_v3, %v207_v25 }
  0x40   :  { %397 = vst.msk [vmem:[%s1085_s3 + $0x1b0] sm:$0xff] %vm342_vm0, %v332_v10  ;;  %v336_v34 = vmax.f32 %v272_v26, 0.0  ;;  %v337_v35 = vmax.f32 %v273_v27, 0.0  ;;  %v276_v1 = vadd.f32 %v603_v3, %v208_v28  ;;  %v277_v36 = vadd.f32 %v603_v3, %v209_v29 }
  0x41   :  { %398 = vst.msk [vmem:[%s1085_s3 + $0x1b8] sm:$0xff] %vm342_vm0, %v333_v11  ;;  %v338_v37 = vmax.f32 %v274_v32, 0.0  ;;  %v339_v38 = vmax.f32 %v275_v33, 0.0 }
  0x42   :  { %399 = vst.msk [vmem:[%s1085_s3 + $0x1c0] sm:$0xff] %vm342_vm0, %v334_v30  ;;  %v340_v39 = vmax.f32 %v276_v1, 0.0  ;;  %v341_v3 = vmax.f32 %v277_v36, 0.0 }
  0x43   :  { %400 = vst.msk [vmem:[%s1085_s3 + $0x1c8] sm:$0xff] %vm342_vm0, %v335_v31 }
  0x44   :  { %401 = vst.msk [vmem:[%s1085_s3 + $0x1d0] sm:$0xff] %vm342_vm0, %v336_v34 }
  0x45   :  { %402 = vst.msk [vmem:[%s1085_s3 + $0x1d8] sm:$0xff] %vm342_vm0, %v337_v35 }
  0x46   :  { %403 = vst.msk [vmem:[%s1085_s3 + $0x1e0] sm:$0xff] %vm342_vm0, %v338_v37 }
  0x47   :  { %404 = vst.msk [vmem:[%s1085_s3 + $0x1e8] sm:$0xff] %vm342_vm0, %v339_v38 }
  0x48   :  { %405 = vst.msk [vmem:[%s1085_s3 + $0x1f0] sm:$0xff] %vm342_vm0, %v340_v39 }
  0x49   :  { %406 = vst.msk [vmem:[%s1085_s3 + $0x1f8] sm:$0xff] %vm342_vm0, %v341_v3 }

// kernel: conv_block_forward.2
= control target key start
LH: loop header
LB: loop body
LE: loop exit
PB: predicated region body
PF: predicated region fallthrough
CT: control target
= control target key end

     0   :  { %s1892_s12 = smov 0   ;;  %s1894_s13 = smov 0   ;;  %s2934_s0 = inlined_call_operand.vmem [shape: bf16[2,18,18,4], index: 0, kind: input, shape index: {}]   ;;  %s2935_s1 = inlined_call_operand.vmem [shape: bf16[36,128], index: 1, kind: input, shape index: {}]   ;;  %s2936_s2 = inlined_call_operand.vmem [shape: bf16[2,16,16,8], index: 2, kind: output, shape index: {0}]   ;;  %s2937_s3 = inlined_call_operand.vmem [shape: f32[1,3,128], index: 3, kind: output, shape index: {1}]  }
   0x1   :  { %s1896_s14 = smov 0  }
   0x2 LB: > { %s26_s15 = sadd.s32 1, %s1857_s13  ;;  %p1670_p0 = scmp.ge.s32.totalorder %s1861_s14, 1  ;;  %s1861_s14 = sphi %s1896_s14, %s14_s14   ;;  %s1857_s13 = sphi %s1894_s13, %s2939_s13   ;;  %s1853_s12 = sphi %s1892_s12, %s2938_s12  }
   0x3   : > { %p28_p1 = scmp.ge.s32.totalorder %s26_s15, 2  ;;  %p158_p2 = scmp.lt.s32.totalorder %s1861_s14, 3 }
   0x5   : > { %s2941_s15 = smov (%p28_p1, %s26_s15), 0  ;;  %p159_p3 = pnand %p1670_p0, %p158_p2 }
   0x6   : > { %p189_p4 = scmp.lt.s32.totalorder (!%p159_p3), %s1853_s12, 1  ;;  %s1863_s21 = smov (!%p159_p3), 12  }
   0x7   : > { %162 = sbr.rel (%p159_p3) target bundleno = 719 (0x2cf), region = 28  ;;  %s1864_s22 = smov (!%p159_p3), 4  }
   0x8   : > { %s1865_s23 = smov (!%p159_p3), 8   ;;  %s1866_s24 = smov (!%p159_p3), 20  }
   0x9   : > { %s1867_s25 = smov (!%p159_p3), 16   ;;  %s1868_s26 = smov (!%p159_p3), 24  }
   0xa   : > { %s1869_s27 = smov (!%p159_p3), 28   ;;  %s1870_s28 = smov (!%p159_p3), 32  }
   0xb   : > { %p1552_p5 = scmp.eq.s32.totalorder (!%p159_p3), %s1853_s12, 0 }
   0xc   : > { %s1914_s16 = scalar_select %p189_p4, %s1853_s12, 1  ;;  %vm389_vm0 = vsmask.f32 7424  ;;  %vm614_vm1 = vcmask 1046528   ;;  %vm1250_vm2 = vcmask 1041408   ;;  %vm933_vm3 = vcmask 31744  }
   0xd   : > { %vm966_vm4 = vcmask 64512   ;;  %vm999_vm5 = vcmask 97280   ;;  %vm1032_vm6 = vcmask 130048   ;;  %vm1065_vm7 = vcmask 162816  }
   0xe   : > { %s1804_s17 = smul.u32 216, %s1914_s16  ;;  %vm1098_vm8 = vcmask 195584   ;;  %vm1131_vm9 = vcmask 228352   ;;  %vm1164_vm10 = vcmask 261120   ;;  %vm1217_vm11 = vcmask 293888   ;;  %s1773_s8 = sshll.u32 %s1914_s16, 7 }
   0xf   : > { %s2431_s11 = scalar_lea.vmem %s2936_s2, %s1773_s8  ;;  %vm1375_vm12 = vcmask 60416   ;;  %vm1549_vm13 = vcmask 1040384  }
  0x10   : > { %s1920_s20 = scalar_lea.vmem %s2934_s0, %s1804_s17 }
  0x11   : > { %v1923_v0 = vld [vmem:[%s1920_s20 + $0xc] sm:$0xff]  ;;  %v1926_v1 = vld [vmem:[%s1920_s20 + $0x18] sm:$0xff]  ;;  %v215_v2 = vld [vmem:[%s1920_s20 + $0x20] sm:$0x1] }
  0x12   : > { %v359_v3 = vunpack.c.l.b16 %v215_v2  ;;  %v1930_v4 = vld [vmem:[%s1920_s20] sm:$0xff]  ;;  %v209_v5 = vld [vmem:[%s1920_s20 + $0x8] sm:$0x1]  ;;  %700 = vrot.lane.b32.xlu0 %v1923_v0, %s1863_s21  ;;  %v415_v7 = vshrl.u32 %v1926_v1, 16  ;;  %v417_v8 = vshll.u32 %v1926_v1, 16  ;;  %v403_v32 = vshrl.u32 %v1923_v0, 16 }
  0x13   : > { %v1934_v6 = vld [vmem:[%s1920_s20 + $0x24] sm:$0xff]  ;;  %v357_v9 = vunpack.c.l.b16 %v209_v5  ;;  %v218_v10 = vld [vmem:[%s1920_s20 + $0x2c] sm:$0x1]  ;;  %v212_v11 = vld [vmem:[%s1920_s20 + $0x14] sm:$0x1]  ;;  %v391_v13 = vshrl.u32 %v1930_v4, 16 }
  0x14   : > { %v1942_v12 = vpack.c.b16 %v359_v3, %v359_v3  ;;  %v393_v14 = vshll.u32 %v1930_v4, 16  ;;  %v360_v15 = vunpack.c.l.b16 %v218_v10  ;;  %v419_v16 = vrot.slane %v417_v8, 1  ;;  %v221_v35 = vld [vmem:[%s1920_s20 + $0x38] sm:$0x1]  ;;  %v1960_v39 = vld [vmem:[%s1920_s20 + $0x30] sm:$0xff]  ;;  %v1999_v8 = vld [vmem:[%s1920_s20 + $0x3c] sm:$0xff] }
  0x15   : > { %v373_v17 = vpack.c.b16 %v357_v9, %v357_v9  ;;  %v429_v18 = vshll.u32 %v1934_v6, 16  ;;  %v358_v22 = vunpack.c.l.b16 %v212_v11  ;;  %v427_v25 = vshrl.u32 %v1934_v6, 16  ;;  %v224_v63 = vld [vmem:[%s1920_s20 + $0x44] sm:$0x1] }
  0x16   : > { %v422_v19 = vshll.u32 %v1942_v12, 16  ;;  %v395_v20 = vrot.slane %v393_v14, 1  ;;  %v1948_v21 = vpack.c.b16 %v360_v15, %v360_v15  ;;  %v420_v23 = vor.u32 %v419_v16, %v415_v7 }
  0x17   : > { %v398_v24 = vshll.u32 %v373_v17, 16  ;;  %v431_v26 = vrot.slane %v429_v18, 1  ;;  %v374_v30 = vpack.c.b16 %v358_v22, %v358_v22  ;;  %v405_v33 = vshll.u32 %v1923_v0, 16 }
  0x18   : > { %v424_v27 = vrot.slane %v422_v19, 1  ;;  %v396_v28 = vor.u32 %v395_v20, %v391_v13  ;;  %v434_v29 = vshll.u32 %v1948_v21, 16  ;;  %v615_v34 = vrot.slane %v1930_v4, 1 }
  0x19   : > { %v400_v31 = vrot.slane %v398_v24, 1  ;;  %v410_v37 = vshll.u32 %v374_v30, 16  ;;  %v616_v38 = vrot.slane %v373_v17, 1  ;;  %v407_v41 = vrot.slane %v405_v33, 1  ;;  %v227_v17 = vld [vmem:[%s1920_s20 + $0x50] sm:$0x1] }
  0x1a   : > { %v1957_v36 = vsel %vm389_vm0, %v420_v23, %v424_v27  ;;  %v432_v42 = vor.u32 %v431_v26, %v427_v25  ;;  %v436_v43 = vrot.slane %v434_v29, 1  ;;  %v361_v45 = vunpack.c.l.b16 %v221_v35  ;;  %v2024_v23 = vld [vmem:[%s1920_s20 + $0x48] sm:$0xff] }
  0x1b   : > { %586 = vrot.lane.b32.xlu1 %v1957_v36, %s1864_s22  ;;  %v401_v40 = vsel %vm389_vm0, %v396_v28, %v400_v31  ;;  %v617_v44 = vsel %vm614_vm1, %v615_v34, %v616_v38  ;;  %v408_v46 = vor.u32 %v407_v41, %v403_v32  ;;  %v412_v47 = vrot.slane %v410_v37, 1  ;;  %v233_v27 = vld [vmem:[%s1920_s20 + $0x68] sm:$0x1]  ;;  %v2039_v31 = vld [vmem:[%s1920_s20 + $0x60] sm:$0xff]  ;;  %v236_v41 = vld [vmem:[%s1920_s20 + $0x74] sm:$0x1] }
  0x1c   : > { %582 = vrot.lane.b32.xlu0 %v401_v40, %s1864_s22  ;;  %663 = vrot.lane.b32.xlu2 %v617_v44, %s1865_s23  ;;  %v618_v48 = vrot.slane %v1923_v0, 1  ;;  %v619_v49 = vrot.slane %v374_v30, 1  ;;  %v377_v50 = vpack.c.b16 %v361_v45, %v361_v45  ;;  %v441_v51 = vshll.u32 %v1960_v39, 16 }
  0x1d   : > { %v1971_v52 = vsel %vm389_vm0, %v432_v42, %v436_v43  ;;  %v413_v53 = vsel %vm389_vm0, %v408_v46, %v412_v47  ;;  %v439_v55 = vshrl.u32 %v1960_v39, 16  ;;  %v621_v61 = vrot.slane %v1926_v1, 1  ;;  %v2060_v47 = vld [vmem:[%s1920_s20 + $0x6c] sm:$0xff] }
  0x1e   : > { %v620_v54 = vsel %vm614_vm1, %v618_v48, %v619_v49  ;;  %v443_v56 = vrot.slane %v441_v51, 1  ;;  %v446_v57 = vshll.u32 %v377_v50, 16  ;;  %v622_v62 = vrot.slane %v1942_v12, 1 }
  0x1f   : > { %v362_v3 = vunpack.c.l.b16 %v224_v63  ;;  %v627_v5 = vrot.slane %v1960_v39, 1  ;;  %v628_v7 = vrot.slane %v377_v50, 1  ;;  %v453_v10 = vshll.u32 %v1999_v8, 16 }
  0x20   : > { %v444_v58 = vor.u32 %v443_v56, %v439_v55  ;;  %v448_v59 = vrot.slane %v446_v57, 1  ;;  %v1992_v2 = vsel %vm614_vm1, %v621_v61, %v622_v62  ;;  %v451_v12 = vshrl.u32 %v1999_v8, 16 }
  0x21   : > { %v378_v9 = vpack.c.b16 %v362_v3, %v362_v3  ;;  %v2005_v11 = vsel %vm614_vm1, %v627_v5, %v628_v7  ;;  %v455_v13 = vrot.slane %v453_v10, 1  ;;  %v363_v19 = vunpack.c.l.b16 %v227_v17 }
  0x22   : > { %v1981_v60 = vsel %vm389_vm0, %v444_v58, %v448_v59  ;;  %v630_v20 = vrot.slane %v1999_v8, 1  ;;  %v465_v25 = vshll.u32 %v2024_v23, 16  ;;  %v463_v28 = vshrl.u32 %v2024_v23, 16  ;;  %v2074_v59 = vld [vmem:[%s1920_s20 + $0x78] sm:$0xff] }
  0x23   : > { %588 = vrot.lane.b32.xlu1 %v1971_v52, %s1864_s22  ;;  %v458_v14 = vshll.u32 %v378_v9, 16  ;;  %v456_v15 = vor.u32 %v455_v13, %v451_v12  ;;  %v631_v22 = vrot.slane %v378_v9, 1  ;;  %v379_v24 = vpack.c.b16 %v363_v19, %v363_v19 }
  0x24   : > { %584 = vrot.lane.b32.xlu0 %v413_v53, %s1864_s22  ;;  %782 = vrot.lane.b32.xlu2 %v620_v54, %s1866_s24  ;;  %v467_v29 = vrot.slane %v465_v25, 1  ;;  %v365_v32 = vunpack.c.l.b16 %v233_v27  ;;  %v624_v33 = vrot.slane %v1934_v6, 1  ;;  %v625_v34 = vrot.slane %v1948_v21, 1 }
  0x25   : > { %v460_v16 = vrot.slane %v458_v14, 1  ;;  %v2030_v26 = vsel %vm614_vm1, %v630_v20, %v631_v22  ;;  %v470_v30 = vshll.u32 %v379_v24, 16  ;;  %v489_v37 = vshll.u32 %v2039_v31, 16 }
  0x26   : > { %v468_v35 = vor.u32 %v467_v29, %v463_v28  ;;  %v381_v38 = vpack.c.b16 %v365_v32, %v365_v32  ;;  %v2047_v40 = vsel %vm614_vm1, %v624_v33, %v625_v34  ;;  %v487_v43 = vshrl.u32 %v2039_v31, 16  ;;  %v1201_v32 = vld [vmem:[%s2935_s1 + $0x10] sm:$0x3] }
  0x27   : > { %v2016_v18 = vsel %vm389_vm0, %v456_v15, %v460_v16  ;;  %v491_v21 = vrot.slane %v489_v37, 1  ;;  %v633_v45 = vrot.slane %v2024_v23, 1  ;;  %v634_v46 = vrot.slane %v379_v24, 1  ;;  %v2136_v37 = vld [vmem:[%s1920_s20 + $0x54] sm:$0xff] }
  0x28   : > { %v494_v44 = vshll.u32 %v381_v38, 16  ;;  %v366_v48 = vunpack.c.l.b16 %v236_v41  ;;  %v639_v49 = vrot.slane %v2039_v31, 1  ;;  %v640_v50 = vrot.slane %v381_v38, 1 }
  0x29   : > { %v492_v51 = vor.u32 %v491_v21, %v487_v43  ;;  %v501_v55 = vshll.u32 %v2060_v47, 16  ;;  %v2068_v56 = vsel %vm614_vm1, %v633_v45, %v634_v46  ;;  %v499_v63 = vshrl.u32 %v2060_v47, 16  ;;  %v1792_v43 = vld [vmem:[%s2935_s1] sm:$0xff]  ;;  %v245_v45 = vld [vmem:[%s1920_s20 + $0x98] sm:$0x1] }
  0x2a   : > { %v382_v57 = vpack.c.b16 %v366_v48, %v366_v48  ;;  %v2071_v58 = vsel %vm614_vm1, %v639_v49, %v640_v50  ;;  %v642_v7 = vrot.slane %v2060_v47, 1  ;;  %v513_v12 = vshll.u32 %v2074_v59, 16  ;;  %v2156_v50 = vld [vmem:[%s1920_s20 + $0x90] sm:$0xff] }
  0x2b   : > { %747 = vrot.lane.b32.xlu1 %v413_v53, %s1867_s25  ;;  %v496_v53 = vrot.slane %v494_v44, 1  ;;  %v503_v3 = vrot.slane %v501_v55, 1  ;;  %v511_v16 = vshrl.u32 %v2074_v59, 16  ;;  %v645_v27 = vrot.slane %v2074_v59, 1 }
  0x2c   : > { %819 = vrot.lane.b32.xlu0 %v1926_v1, %s1868_s26  ;;  %590 = vrot.lane.b32.xlu2 %v1981_v60, %s1864_s22  ;;  %v506_v5 = vshll.u32 %v382_v57, 16  ;;  %v643_v9 = vrot.slane %v382_v57, 1  ;;  %v515_v17 = vrot.slane %v513_v12, 1  ;;  %v1211_v33 = vunpack.c.l.b16 %v1201_v32 }
  0x2d   : > { %v2077_v62 = vsel %vm389_vm0, %v492_v51, %v496_v53  ;;  %v504_v13 = vor.u32 %v503_v3, %v499_v63  ;;  %v477_v41 = vshll.u32 %v2136_v37, 16  ;;  %v475_v46 = vshrl.u32 %v2136_v37, 16 }
  0x2e   : > { %v508_v14 = vrot.slane %v506_v5, 1  ;;  %v2089_v15 = vsel %vm614_vm1, %v642_v7, %v643_v9  ;;  %v516_v22 = vor.u32 %v515_v17, %v511_v16  ;;  %v1214_v34 = vpack.c.b16 %v1211_v33, %v1211_v33 }
  0x2f   : > { %v479_v48 = vrot.slane %v477_v41, 1  ;;  %v369_v51 = vunpack.c.l.b16 %v245_v45  ;;  %v636_v57 = vrot.slane %v2136_v37, 1  ;;  %v537_v5 = vshll.u32 %v2156_v50, 16 }
  0x30   : > { %v2093_v20 = vsel %vm389_vm0, %v504_v13, %v508_v14  ;;  %v535_v12 = vshrl.u32 %v2156_v50, 16 }
  0x31   : > { %v480_v53 = vor.u32 %v479_v48, %v475_v46  ;;  %v385_v3 = vpack.c.b16 %v369_v51, %v369_v51  ;;  %v539_v13 = vrot.slane %v537_v5, 1 }
  0x33   : > { %866 = vrot.lane.b32.xlu1 %v1957_v36, %s1869_s27  ;;  %v542_v14 = vshll.u32 %v385_v3, 16 }
  0x34   : > { %665 = vrot.lane.b32.xlu0 %v620_v54, %s1865_s23  ;;  %901 = vrot.lane.b32.xlu2 %v1992_v2, %s1870_s28  ;;  %v239_v54 = vld [vmem:[%s1920_s20 + $0x80] sm:$0x1] }
  0x35   : > { %v367_v61 = vunpack.c.l.b16 %v239_v54 }
  0x37   : > { %v383_v10 = vpack.c.b16 %v367_v61, %v367_v61 }
  0x39   : > { %v518_v19 = vshll.u32 %v383_v10, 16  ;;  %v646_v28 = vrot.slane %v383_v10, 1 }
  0x3b   : > { %671 = vrot.lane.b32.xlu1 %v2005_v11, %s1865_s23  ;;  %v520_v24 = vrot.slane %v518_v19, 1  ;;  %v2112_v29 = vsel %vm614_vm1, %v645_v27, %v646_v28  ;;  %v540_v19 = vor.u32 %v539_v13, %v535_v12  ;;  %v248_v27 = vld [vmem:[%s1920_s20 + $0xa4] sm:$0x1]  ;;  %v242_v13 = vld [vmem:[%s1920_s20 + $0x8c] sm:$0x1] }
  0x3c   : > { %708 = vrot.lane.b32.xlu0 %v1999_v8, %s1863_s21  ;;  %702 = vrot.lane.b32.xlu2 %v1926_v1, %s1863_s21  ;;  %v370_v33 = vunpack.c.l.b16 %v248_v27  ;;  %v2235_v27 = vld [vmem:[%s1920_s20 + $0x84] sm:$0xff] }
  0x3d   : > { %v2102_v25 = vsel %vm389_vm0, %v516_v22, %v520_v24  ;;  %v544_v22 = vrot.slane %v542_v14, 1  ;;  %v2229_v14 = vld [vmem:[%s1920_s20 + $0xa8] sm:$0xff] }
  0x3f   : > { %v2191_v32 = vsel %vm389_vm0, %v540_v19, %v544_v22 }
  0x43   : > { %749 = vrot.lane.b32.xlu1 %v1957_v36, %s1867_s25  ;;  %v472_v36 = vrot.slane %v470_v30, 1 }
  0x44   : > { %784 = vrot.lane.b32.xlu0 %v1992_v2, %s1866_s24  ;;  %755 = vrot.lane.b32.xlu2 %v2016_v18, %s1867_s25 }
  0x45   : > { %v2051_v42 = vsel %vm389_vm0, %v468_v35, %v472_v36  ;;  %v1252_v35 = vsel %vm1250_vm2, %v1214_v34, 0 }
  0x46   : > { %1259 = vmatpush.bf16.msra.mxu0 %v1252_v35  ;;  %1795 = vmatpush.bf16.msra.mxu1 %v1252_v35 }
  0x47   : > { %1796 = vmatpush.bf16.msra.mxu2 %v1252_v35  ;;  %1797 = vmatpush.bf16.msra.mxu3 %v1252_v35  ;;  %v652_v35 = vrot.slane %v385_v3, 1  ;;  %v251_v3 = vld [vmem:[%s1920_s20 + $0xb0] sm:$0x1] }
  0x48   : > { %v371_v19 = vunpack.c.l.b16 %v251_v3 }
  0x4b   : > { %790 = vrot.lane.b32.xlu1 %v2030_v26, %s1866_s24 }
  0x4c   : > { %827 = vrot.lane.b32.xlu0 %v2024_v23, %s1868_s26  ;;  %821 = vrot.lane.b32.xlu2 %v1934_v6, %s1868_s26 }
  0x53   : > { %868 = vrot.lane.b32.xlu1 %v1971_v52, %s1869_s27 }
  0x54   : > { %903 = vrot.lane.b32.xlu0 %v2047_v40, %s1870_s28  ;;  %874 = vrot.lane.b32.xlu2 %v2051_v42, %s1869_s27 }
  0x5b   : > { %909 = vrot.lane.b32.xlu1 %v2068_v56, %s1870_s28 }
  0x5c   : > { %679 = vrot.lane.b32.xlu0 %v2071_v58, %s1865_s23  ;;  %598 = vrot.lane.b32.xlu2 %v2077_v62, %s1864_s22 }
  0x63   : > { %716 = vrot.lane.b32.xlu1 %v2060_v47, %s1863_s21 }
  0x64   : > { %798 = vrot.lane.b32.xlu0 %v2089_v15, %s1866_s24  ;;  %763 = vrot.lane.b32.xlu2 %v2093_v20, %s1867_s25 }
  0x6b   : > { %835 = vrot.lane.b32.xlu1 %v2074_v59, %s1868_s26 }
  0x6c   : > { %882 = vrot.lane.b32.xlu0 %v2102_v25, %s1869_s27  ;;  %592 = vrot.lane.b32.xlu2 %v2016_v18, %s1864_s22 }
  0x73   : > { %667 = vrot.lane.b32.xlu1 %v1992_v2, %s1865_s23  ;;  %v230_v2 = vld [vmem:[%s1920_s20 + $0x5c] sm:$0x1] }
  0x74   : > { %917 = vrot.lane.b32.xlu0 %v2112_v29, %s1870_s28  ;;  %673 = vrot.lane.b32.xlu2 %v2030_v26, %s1865_s23 }
  0x76   : > { %v2120_v30 = vpop.permute.xlu2 %663 }
  0x7b   : > { %704 = vrot.lane.b32.xlu1 %v1934_v6, %s1863_s21  ;;  %v364_v6 = vunpack.c.l.b16 %v230_v2  ;;  %v651_v2 = vrot.slane %v2156_v50, 1 }
  0x7c   : > { %751 = vrot.lane.b32.xlu0 %v1971_v52, %s1867_s25  ;;  %710 = vrot.lane.b32.xlu2 %v2024_v23, %s1863_s21  ;;  %v1793_v52 = vld [vmem:[%s2935_s1 + $0x8] sm:$0xff] }
  0x7d   : > { %1260 = vmatpush.bf16.msra.mxu0 %v1793_v52  ;;  %1798 = vmatpush.bf16.msra.mxu1 %v1793_v52  ;;  %v380_v38 = vpack.c.b16 %v364_v6, %v364_v6  ;;  %v2201_v6 = vld [vmem:[%s1920_s20 + $0x9c] sm:$0xff]  ;;  %v2211_v46 = vsel %vm614_vm1, %v651_v2, %v652_v35  ;;  %v387_v2 = vpack.c.b16 %v371_v19, %v371_v19  ;;  %v561_v35 = vshll.u32 %v2229_v14, 16 }
  0x7e   : > { %v2133_v36 = vpop.permute.xlu2 %782  ;;  %1799 = vmatpush.bf16.msra.mxu2 %v1793_v52  ;;  %1800 = vmatpush.bf16.msra.mxu3 %v1793_v52  ;;  %v549_v41 = vshll.u32 %v2201_v6, 16 }
  0x7f   : > { %v482_v49 = vshll.u32 %v380_v38, 16  ;;  %v637_v61 = vrot.slane %v380_v38, 1  ;;  %v386_v38 = vpack.c.b16 %v370_v33, %v370_v33 }
  0x81   : > { %1261 = vmatpush.bf16.msra.mxu0 %v1792_v43  ;;  %1801 = vmatpush.bf16.msra.mxu1 %v1792_v43  ;;  %v484_v54 = vrot.slane %v482_v49, 1  ;;  %v2172_v10 = vsel %vm614_vm1, %v636_v57, %v637_v61  ;;  %v547_v49 = vshrl.u32 %v2201_v6, 16  ;;  %v554_v51 = vshll.u32 %v386_v38, 16 }
  0x82   : > { %1802 = vmatpush.bf16.msra.mxu2 %v1792_v43  ;;  %1803 = vmatpush.bf16.msra.mxu3 %v1792_v43  ;;  %v655_v33 = vrot.slane %v386_v38, 1  ;;  %v523_v38 = vshrl.u32 %v2235_v27, 16 }
  0x83   : > { %757 = vrot.lane.b32.xlu1 %v2051_v42, %s1867_s25  ;;  %v2169_v9 = vsel %vm389_vm0, %v480_v53, %v484_v54 }
  0x84   : > { %792 = vrot.lane.b32.xlu0 %v2068_v56, %s1866_s24  ;;  %v701_v21 = vpop.permute.xlu0 %700  ;;  %786 = vrot.lane.b32.xlu2 %v2047_v40, %s1866_s24 }
  0x86   : > { %v2151_v44 = vpop.permute.xlu2 %590 }
  0x8b   : > { %823 = vrot.lane.b32.xlu1 %v1960_v39, %s1868_s26 }
  0x8c   : > { %870 = vrot.lane.b32.xlu0 %v1981_v60, %s1869_s27  ;;  %829 = vrot.lane.b32.xlu2 %v2136_v37, %s1868_s26 }
  0x8d   : > { %v2162_v55 = vpop.permute.xlu1 %586 }
  0x8e   : > { %v583_v63 = vpop.permute.xlu0 %582  ;;  %v902_v7 = vpop.permute.xlu2 %901 }
  0x8f   : > { %v935_v28 = vsel %vm933_vm3, %v1930_v4, %v583_v63  ;;  %v556_v63 = vrot.slane %v554_v51, 1 }
  0x90   : > { %v968_v34 = vsel %vm966_vm4, %v935_v28, %v2120_v30  ;;  %v368_v28 = vunpack.c.l.b16 %v242_v13 }
  0x91   : > { %v1001_v52 = vsel %vm999_vm5, %v968_v34, %v701_v21  ;;  %v551_v21 = vrot.slane %v549_v41, 1 }
  0x93   : > { %876 = vrot.lane.b32.xlu1 %v2169_v9, %s1869_s27  ;;  %v552_v61 = vor.u32 %v551_v21, %v547_v49  ;;  %v563_v49 = vrot.slane %v561_v35, 1  ;;  %v566_v21 = vshll.u32 %v387_v2, 16 }
  0x94   : > { %911 = vrot.lane.b32.xlu0 %v2172_v10, %s1870_s28  ;;  %905 = vrot.lane.b32.xlu2 %v2005_v11, %s1870_s28 }
  0x95   : > { %v2179_v16 = vpop.permute.xlu1 %588  ;;  %v2232_v22 = vsel %vm389_vm0, %v552_v61, %v556_v63  ;;  %v568_v61 = vrot.slane %v566_v21, 1 }
  0x96   : > { %v2183_v17 = vpop.permute.xlu0 %584  ;;  %v2185_v24 = vpop.permute.xlu2 %702 }
  0x9b   : > { %600 = vrot.lane.b32.xlu1 %v2093_v20, %s1864_s22 }
  0x9c   : > { %681 = vrot.lane.b32.xlu0 %v2089_v15, %s1865_s23  ;;  %606 = vrot.lane.b32.xlu2 %v2191_v32, %s1864_s22 }
  0x9d   : > { %v748_v4 = vpop.permute.xlu1 %747 }
  0x9e   : > { %v820_v30 = vpop.permute.xlu0 %819  ;;  %v1034_v43 = vsel %vm1032_vm6, %v1001_v52, %v748_v4  ;;  %v2208_v45 = vpop.permute.xlu2 %755  ;;  %v384_v52 = vpack.c.b16 %v368_v28, %v368_v28  ;;  %v937_v28 = vsel %vm933_vm3, %v1923_v0, %v2183_v17 }
  0x9f   : > { %v1067_v48 = vsel %vm1065_vm7, %v1034_v43, %v2133_v36 }
  0xa0   : > { %v1100_v53 = vsel %vm1098_vm8, %v1067_v48, %v820_v30  ;;  %v525_v30 = vshll.u32 %v2235_v27, 16  ;;  %v559_v48 = vshrl.u32 %v2229_v14, 16 }
  0xa2   : > { %v527_v51 = vrot.slane %v525_v30, 1  ;;  %v648_v30 = vrot.slane %v2235_v27, 1 }
  0xa3   : > { %687 = vrot.lane.b32.xlu1 %v2211_v46, %s1865_s23 }
  0xa4   : > { %724 = vrot.lane.b32.xlu0 %v2201_v6, %s1863_s21  ;;  %718 = vrot.lane.b32.xlu2 %v2074_v59, %s1863_s21  ;;  %v528_v3 = vor.u32 %v527_v51, %v523_v38 }
  0xa5   : > { %v867_v54 = vpop.permute.xlu1 %866 }
  0xa6   : > { %v1133_v36 = vsel %vm1131_vm9, %v1100_v53, %v867_v54  ;;  %v666_v57 = vpop.permute.xlu0 %665  ;;  %v822_v12 = vpop.permute.xlu2 %821  ;;  %v530_v53 = vshll.u32 %v384_v52, 16 }
  0xa7   : > { %v1166_v5 = vsel %vm1164_vm10, %v1133_v36, %v902_v7  ;;  %v654_v7 = vrot.slane %v2201_v6, 1  ;;  %v564_v36 = vor.u32 %v563_v49, %v559_v48  ;;  %v649_v48 = vrot.slane %v384_v52, 1 }
  0xa8   : > { %1754 = vmatmul.msk.bf16.vlgmr.msra.gmra.mxu0 %vm1217_vm11, %v1166_v5  ;;  %v532_v5 = vrot.slane %v530_v53, 1 }
  0xa9   : > { %v2247_v43 = vsel %vm614_vm1, %v654_v7, %v655_v33  ;;  %v2258_v19 = vsel %vm389_vm0, %v564_v36, %v568_v61  ;;  %v970_v33 = vsel %vm966_vm4, %v937_v28, %v666_v57  ;;  %v943_v57 = vsel %vm933_vm3, %v1960_v39, %v2151_v44 }
  0xaa   : > { %v2264_v7 = vsel %vm389_vm0, %v528_v3, %v532_v5  ;;  %v1003_v0 = vsel %vm999_vm5, %v970_v33, %v2185_v24  ;;  %v2282_v38 = vsel %vm614_vm1, %v648_v30, %v649_v48  ;;  %v657_v44 = vrot.slane %v2229_v14, 1 }
  0xab   : > { %765 = vrot.lane.b32.xlu1 %v2102_v25, %s1867_s25  ;;  %v658_v24 = vrot.slane %v387_v2, 1 }
  0xac   : > { %800 = vrot.lane.b32.xlu0 %v2112_v29, %s1866_s24  ;;  %771 = vrot.lane.b32.xlu2 %v2232_v22, %s1867_s25 }
  0xad   : > { %v672_v34 = vpop.permute.xlu1 %671  ;;  %v2301_v2 = vsel %vm614_vm1, %v657_v44, %v658_v24  ;;  %v939_v24 = vsel %vm933_vm3, %v1926_v1, %v2162_v55 }
  0xae   : > { %v709_v4 = vpop.permute.xlu0 %708  ;;  %v875_v41 = vpop.permute.xlu2 %874  ;;  %v976_v21 = vsel %vm966_vm4, %v943_v57, %v672_v34 }
  0xaf   : > { %v1009_v51 = vsel %vm999_vm5, %v976_v21, %v709_v4 }
  0xb0   : > { %v1042_v34 = vsel %vm1032_vm6, %v1009_v51, %v2208_v45 }
  0xb3   : > { %806 = vrot.lane.b32.xlu1 %v2247_v43, %s1866_s24 }
  0xb4   : > { %843 = vrot.lane.b32.xlu0 %v2229_v14, %s1868_s26  ;;  %837 = vrot.lane.b32.xlu2 %v2235_v27, %s1868_s26 }
  0xb5   : > { %v750_v54 = vpop.permute.xlu1 %749 }
  0xb6   : > { %v785_v63 = vpop.permute.xlu0 %784  ;;  %v599_v13 = vpop.permute.xlu2 %598 }
  0xbb   : > { %594 = vrot.lane.b32.xlu1 %v2051_v42, %s1864_s22  ;;  %v1036_v42 = vsel %vm1032_vm6, %v1003_v0, %v750_v54 }
  0xbc   : > { %890 = vrot.lane.b32.xlu0 %v2258_v19, %s1869_s27  ;;  %884 = vrot.lane.b32.xlu2 %v2264_v7, %s1869_s27  ;;  %v1069_v52 = vsel %vm1065_vm7, %v1036_v42, %v785_v63 }
  0xbd   : > { %v791_v35 = vpop.permute.xlu1 %790  ;;  %v1102_v54 = vsel %vm1098_vm8, %v1069_v52, %v822_v12 }
  0xbe   : > { %v828_v17 = vpop.permute.xlu0 %827  ;;  %v764_v49 = vpop.permute.xlu2 %763 }
  0xc3   : > { %669 = vrot.lane.b32.xlu1 %v2047_v40, %s1865_s23  ;;  %v1075_v40 = vsel %vm1065_vm7, %v1042_v34, %v791_v35 }
  0xc4   : > { %919 = vrot.lane.b32.xlu0 %v2282_v38, %s1870_s28  ;;  %675 = vrot.lane.b32.xlu2 %v2068_v56, %s1865_s23  ;;  %v1108_v12 = vsel %vm1098_vm8, %v1075_v40, %v828_v17 }
  0xc5   : > { %v869_v53 = vpop.permute.xlu1 %868  ;;  %v1141_v45 = vsel %vm1131_vm9, %v1108_v12, %v875_v41  ;;  %v951_v41 = vsel %vm933_vm3, %v2039_v31, %v599_v13 }
  0xc6   : > { %v1135_v4 = vsel %vm1131_vm9, %v1102_v54, %v869_v53  ;;  %v904_v36 = vpop.permute.xlu0 %903  ;;  %v593_v63 = vpop.permute.xlu2 %592 }
  0xc7   : > { %v1168_v61 = vsel %vm1164_vm10, %v1135_v4, %v904_v36 }
  0xc8   : > { %1755 = vmatmul.msk.bf16.gmra.mxu0 %vm1217_vm11, %v1168_v61  ;;  %v254_v61 = vld [vmem:[%s1920_s20 + $0xbc] sm:$0x1] }
  0xcb   : > { %925 = vrot.lane.b32.xlu1 %v2301_v2, %s1870_s28 }
  0xcc   : > { %712 = vrot.lane.b32.xlu0 %v2136_v37, %s1863_s21  ;;  %706 = vrot.lane.b32.xlu2 %v1960_v39, %s1863_s21 }
  0xcd   : > { %v910_v56 = vpop.permute.xlu1 %909 }
  0xce   : > { %v680_v3 = vpop.permute.xlu0 %679  ;;  %v1174_v5 = vsel %vm1164_vm10, %v1141_v45, %v910_v56  ;;  %v674_v28 = vpop.permute.xlu2 %673 }
  0xcf   : > { %1758 = vmatmul.msk.bf16.vlgmr.msra.gmra.mxu1 %vm1217_vm11, %v1174_v5  ;;  %v984_v30 = vsel %vm966_vm4, %v951_v41, %v680_v3 }
  0xd3   : > { %753 = vrot.lane.b32.xlu1 %v1981_v60, %s1867_s25 }
  0xd4   : > { %788 = vrot.lane.b32.xlu0 %v2005_v11, %s1866_s24  ;;  %759 = vrot.lane.b32.xlu2 %v2169_v9, %s1867_s25 }
  0xd5   : > { %v717_v33 = vpop.permute.xlu1 %716 }
  0xd6   : > { %v799_v39 = vpop.permute.xlu0 %798  ;;  %v711_v35 = vpop.permute.xlu2 %710  ;;  %v1017_v48 = vsel %vm999_vm5, %v984_v30, %v717_v33  ;;  %v372_v33 = vunpack.c.l.b16 %v254_v61 }
  0xd7   : > { %v1050_v0 = vsel %vm1032_vm6, %v1017_v48, %v764_v49 }
  0xd8   : > { %v1083_v17 = vsel %vm1065_vm7, %v1050_v0, %v799_v39  ;;  %v388_v39 = vpack.c.b16 %v372_v33, %v372_v33 }
  0xdb   : > { %794 = vrot.lane.b32.xlu1 %v2172_v10, %s1866_s24 }
  0xdc   : > { %831 = vrot.lane.b32.xlu0 %v2039_v31, %s1868_s26  ;;  %825 = vrot.lane.b32.xlu2 %v1999_v8, %s1868_s26 }
  0xdd   : > { %v836_v60 = vpop.permute.xlu1 %835 }
  0xde   : > { %v883_v11 = vpop.permute.xlu0 %882  ;;  %v787_v13 = vpop.permute.xlu2 %786  ;;  %v1116_v57 = vsel %vm1098_vm8, %v1083_v17, %v836_v60 }
  0xdf   : > { %v1149_v21 = vsel %vm1131_vm9, %v1116_v57, %v883_v11 }
  0xe3   : > { %872 = vrot.lane.b32.xlu1 %v2016_v18, %s1869_s27 }
  0xe4   : > { %907 = vrot.lane.b32.xlu0 %v2030_v26, %s1870_s28  ;;  %878 = vrot.lane.b32.xlu2 %v2077_v62, %s1869_s27 }
  0xe5   : > { %v668_v42 = vpop.permute.xlu1 %667 }
  0xe6   : > { %v918_v52 = vpop.permute.xlu0 %917  ;;  %v830_v51 = vpop.permute.xlu2 %829  ;;  %v972_v54 = vsel %vm966_vm4, %v939_v24, %v668_v42  ;;  %v578_v42 = vshll.u32 %v388_v39, 16  ;;  %v661_v24 = vrot.slane %v388_v39, 1 }
  0xe7   : > { %v1182_v49 = vsel %vm1164_vm10, %v1149_v21, %v918_v52 }
  0xe8   : > { %1762 = vmatmul.msk.bf16.vlgmr.msra.gmra.mxu2 %vm1217_vm11, %v1182_v49  ;;  %v580_v52 = vrot.slane %v578_v42, 1 }
  0xeb   : > { %913 = vrot.lane.b32.xlu1 %v2071_v58, %s1870_s28 }
  0xec   : > { %608 = vrot.lane.b32.xlu0 %v2232_v22, %s1864_s22  ;;  %602 = vrot.lane.b32.xlu2 %v2102_v25, %s1864_s22 }
  0xed   : > { %v705_v18 = vpop.permute.xlu1 %704 }
  0xee   : > { %v752_v26 = vpop.permute.xlu0 %751  ;;  %v906_v44 = vpop.permute.xlu2 %905  ;;  %v1005_v34 = vsel %vm999_vm5, %v972_v54, %v705_v18 }
  0xef   : > { %v1038_v36 = vsel %vm1032_vm6, %v1005_v34, %v752_v26 }
  0xf0   : > { %v1071_v55 = vsel %vm1065_vm7, %v1038_v36, %v787_v13 }
  0xf3   : > { %683 = vrot.lane.b32.xlu1 %v2112_v29, %s1865_s23  ;;  %v945_v29 = vsel %vm933_vm3, %v1999_v8, %v593_v63 }
  0xf4   : > { %720 = vrot.lane.b32.xlu0 %v2235_v27, %s1863_s21  ;;  %689 = vrot.lane.b32.xlu2 %v2247_v43, %s1865_s23  ;;  %v978_v40 = vsel %vm966_vm4, %v945_v29, %v674_v28  ;;  %v2378_v28 = vld [vmem:[%s1920_s20 + $0xb4] sm:$0xff] }
  0xf5   : > { %v758_v53 = vpop.permute.xlu1 %757  ;;  %v1011_v8 = vsel %vm999_vm5, %v978_v40, %v711_v35  ;;  %v573_v35 = vshll.u32 %v2378_v28, 16  ;;  %v571_v17 = vshrl.u32 %v2378_v28, 16 }
  0xf6   : > { %v793_v25 = vpop.permute.xlu0 %792  ;;  %v2358_v4 = vpop.permute.xlu2 %606  ;;  %v1044_v56 = vsel %vm1032_vm6, %v1011_v8, %v758_v53 }
  0xf7   : > { %v1077_v41 = vsel %vm1065_vm7, %v1044_v56, %v793_v25  ;;  %v575_v57 = vrot.slane %v573_v35, 1 }
  0xf8   : > { %v1110_v48 = vsel %vm1098_vm8, %v1077_v41, %v830_v51  ;;  %v257_v41 = vld [vmem:[%s1920_s20 + $0xc8] sm:$0x1] }
  0xf9   : > { %v576_v21 = vor.u32 %v575_v57, %v571_v17 }
  0xfb   : > { %726 = vrot.lane.b32.xlu1 %v2229_v14, %s1863_s21  ;;  %v2403_v26 = vsel %vm389_vm0, %v576_v21, %v580_v52 }
  0xfc   : > { %773 = vrot.lane.b32.xlu0 %v2258_v19, %s1867_s25  ;;  %767 = vrot.lane.b32.xlu2 %v2264_v7, %s1867_s25 }
  0xfd   : > { %v824_v1 = vpop.permute.xlu1 %823 }
  0xfe   : > { %v1104_v63 = vsel %vm1098_vm8, %v1071_v55, %v824_v1  ;;  %v871_v12 = vpop.permute.xlu0 %870  ;;  %v719_v3 = vpop.permute.xlu2 %718 }
  0xff   : > { %v1137_v45 = vsel %vm1131_vm9, %v1104_v63, %v871_v12 }
 0x100   : > { %v1170_v5 = vsel %vm1164_vm10, %v1137_v45, %v906_v44  ;;  %v660_v44 = vrot.slane %v2378_v28, 1 }
 0x101   : > { %1756 = vmatmul.msk.bf16.gmra.mxu0 %vm1217_vm11, %v1170_v5 }
 0x102   : > { %v2413_v25 = vsel %vm614_vm1, %v660_v44, %v661_v24 }
 0x103   : > { %802 = vrot.lane.b32.xlu1 %v2282_v38, %s1866_s24 }
 0x104   : > { %839 = vrot.lane.b32.xlu0 %v2156_v50, %s1868_s26  ;;  %808 = vrot.lane.b32.xlu2 %v2301_v2, %s1866_s24 }
 0x105   : > { %v877_v30 = vpop.permute.xlu1 %876 }
 0x106   : > { %v1143_v60 = vsel %vm1131_vm9, %v1110_v48, %v877_v30  ;;  %v912_v11 = vpop.permute.xlu0 %911  ;;  %v2392_v13 = vpop.permute.xlu2 %771  ;;  %v2487_v30 = vld [vmem:[%s1920_s20 + $0xc0] sm:$0xff]  ;;  %v733_v48 = vunpack.c.l.b16 %v257_v41 }
 0x107   : > { %v1176_v0 = vsel %vm1164_vm10, %v1143_v60, %v912_v11  ;;  %v736_v21 = vshrl.u32 %v2487_v30, 16 }
 0x108   : > { %1759 = vmatmul.msk.bf16.gmra.mxu1 %vm1217_vm11, %v1176_v0  ;;  %v734_v0 = vpack.c.b16 %v733_v48, %v733_v48 }
 0x10b   : > { %845 = vrot.lane.b32.xlu1 %v2378_v28, %s1868_s26 }
 0x10c   : > { %886 = vrot.lane.b32.xlu0 %v2191_v32, %s1869_s27  ;;  %596 = vrot.lane.b32.xlu2 %v2169_v9, %s1864_s22 }
 0x10d   : > { %v601_v49 = vpop.permute.xlu1 %600 }
 0x10e   : > { %v682_v51 = vpop.permute.xlu0 %681  ;;  %v838_v18 = vpop.permute.xlu2 %837 }
 0x113   : > { %892 = vrot.lane.b32.xlu1 %v2403_v26, %s1869_s27 }
 0x114   : > { %921 = vrot.lane.b32.xlu0 %v2211_v46, %s1870_s28  ;;  %677 = vrot.lane.b32.xlu2 %v2172_v10, %s1865_s23 }
 0x115   : > { %v688_v53 = vpop.permute.xlu1 %687 }
 0x116   : > { %v725_v9 = vpop.permute.xlu0 %724  ;;  %v885_v54 = vpop.permute.xlu2 %884 }
 0x11b   : > { %927 = vrot.lane.b32.xlu1 %v2413_v25, %s1870_s28 }
 0x11c   : > { %761 = vrot.lane.b32.xlu0 %v2077_v62, %s1867_s25  ;;  %714 = vrot.lane.b32.xlu2 %v2039_v31, %s1863_s21  ;;  %v953_v31 = vsel %vm933_vm3, %v2060_v47, %v601_v49  ;;  %v743_v49 = vshll.u32 %v734_v0, 16 }
 0x11d   : > { %v766_v34 = vpop.permute.xlu1 %765  ;;  %v986_v1 = vsel %vm966_vm4, %v953_v31, %v682_v51 }
 0x11e   : > { %v801_v29 = vpop.permute.xlu0 %800  ;;  %v2421_v36 = vpop.permute.xlu2 %675  ;;  %v1019_v55 = vsel %vm999_vm5, %v986_v1, %v719_v3  ;;  %v745_v44 = vrot.slane %v743_v49, 1 }
 0x123   : > { %796 = vrot.lane.b32.xlu1 %v2071_v58, %s1866_s24 }
 0x124   : > { %880 = vrot.lane.b32.xlu0 %v2093_v20, %s1869_s27  ;;  %833 = vrot.lane.b32.xlu2 %v2060_v47, %s1868_s26  ;;  %v1052_v47 = vsel %vm1032_vm6, %v1019_v55, %v766_v34 }
 0x125   : > { %v807_v10 = vpop.permute.xlu1 %806  ;;  %v2433_v62 = vpop.f32.mrf.mxu0 }
 0x126   : > { %v1343_v58 = vpack.c.bf16 %v2433_v62, %v2433_v62  ;;  %v844_v20 = vpop.permute.xlu0 %843  ;;  %v2441_v40 = vpop.permute.xlu2 %706 }
 0x128   : > { %1376 = vst.msk [vmem:[%s2431_s11] sm:$0xf] %vm1375_vm12, %v1343_v58 }
 0x12b   : > { %915 = vrot.lane.b32.xlu1 %v2089_v15, %s1870_s28  ;;  %v959_v15 = vsel %vm933_vm3, %v2156_v50, %v2358_v4 }
 0x12c   : > { %610 = vrot.lane.b32.xlu0 %v2258_v19, %s1864_s22  ;;  %604 = vrot.lane.b32.xlu2 %v2264_v7, %s1864_s22  ;;  %v1085_v19 = vsel %vm1065_vm7, %v1052_v47, %v801_v29  ;;  %v992_v45 = vsel %vm966_vm4, %v959_v15, %v688_v53  ;;  %v260_v47 = vld [vmem:[%s1920_s20 + $0xd4] sm:$0x1] }
 0x12d   : > { %v2452_v61 = vpop.permute.xlu1 %594  ;;  %v2454_v8 = vpop.f32.mrf.mxu0  ;;  %v1118_v7 = vsel %vm1098_vm8, %v1085_v19, %v838_v18  ;;  %v1025_v3 = vsel %vm999_vm5, %v992_v45, %v725_v9  ;;  %v1791_v19 = vld [vmem:[%s1920_s20 + $0xcc] sm:$0xff]  ;;  %v852_v45 = vunpack.c.l.b16 %v260_v47 }
 0x12e   : > { %v1344_v63 = vpack.c.bf16 %v2454_v8, %v2454_v8  ;;  %v891_v12 = vpop.permute.xlu0 %890  ;;  %v2463_v56 = vpop.permute.xlu2 %759  ;;  %v1151_v5 = vsel %vm1131_vm9, %v1118_v7, %v885_v54  ;;  %v1838_v54 = vld [vmem:[%s1920_s20 + $0x24] sm:$0xff] }
 0x12f   : > { %v941_v34 = vsel %vm933_vm3, %v1838_v54, %v2179_v16  ;;  %v853_v41 = vpack.c.b16 %v852_v45, %v852_v45 }
 0x130   : > { %1377 = vst.msk [vmem:[%s2431_s11 + $0x4] sm:$0xf] %vm1375_vm12, %v1344_v63  ;;  %v947_v63 = vsel %vm933_vm3, %v2024_v23, %v2452_v61 }
 0x131   : > { %v980_v7 = vsel %vm966_vm4, %v947_v63, %v2421_v36 }
 0x133   : > { %685 = vrot.lane.b32.xlu1 %v2282_v38, %s1865_s23  ;;  %v1058_v38 = vsel %vm1032_vm6, %v1025_v3, %v2392_v13  ;;  %v738_v13 = vshll.u32 %v2487_v30, 16 }
 0x134   : > { %722 = vrot.lane.b32.xlu0 %v2156_v50, %s1863_s21  ;;  %691 = vrot.lane.b32.xlu2 %v2301_v2, %s1865_s23  ;;  %v1091_v50 = vsel %vm1065_vm7, %v1058_v38, %v807_v10 }
 0x135   : > { %v670_v4 = vpop.permute.xlu1 %669  ;;  %v1124_v2 = vsel %vm1098_vm8, %v1091_v50, %v844_v20  ;;  %v740_v52 = vrot.slane %v738_v13, 1 }
 0x136   : > { %v920_v33 = vpop.permute.xlu0 %919  ;;  %v2480_v35 = vpop.permute.xlu2 %825  ;;  %v1157_v60 = vsel %vm1131_vm9, %v1124_v2, %v891_v12  ;;  %v974_v29 = vsel %vm966_vm4, %v941_v34, %v670_v4 }
 0x137   : > { %v1184_v39 = vsel %vm1164_vm10, %v1151_v5, %v920_v33  ;;  %v741_v18 = vor.u32 %v740_v52, %v736_v21  ;;  %v1007_v16 = vsel %vm999_vm5, %v974_v29, %v2441_v40  ;;  %v780_v40 = vrot.slane %v734_v0, 1 }
 0x138   : > { %1763 = vmatmul.msk.bf16.gmra.mxu2 %vm1217_vm11, %v1184_v39  ;;  %v857_v39 = vshll.u32 %v1791_v19, 16 }
 0x13b   : > { %728 = vrot.lane.b32.xlu1 %v2378_v28, %s1863_s21 }
 0x13c   : > { %775 = vrot.lane.b32.xlu0 %v2403_v26, %s1867_s25  ;;  %769 = vrot.lane.b32.xlu2 %v2191_v32, %s1867_s25 }
 0x13d   : > { %v926_v11 = vpop.permute.xlu1 %925 }
 0x13e   : > { %v713_v17 = vpop.permute.xlu0 %712  ;;  %v1190_v57 = vsel %vm1164_vm10, %v1157_v60, %v926_v11  ;;  %v2500_v42 = vpop.permute.xlu2 %878  ;;  %v859_v60 = vrot.slane %v857_v39, 1  ;;  %v862_v11 = vshll.u32 %v853_v41, 16 }
 0x13f   : > { %1766 = vmatmul.msk.bf16.vlgmr.msra.gmra.mxu3 %vm1217_vm11, %v1190_v57  ;;  %v1013_v23 = vsel %vm999_vm5, %v980_v7, %v713_v17 }
 0x140   : > { %v864_v57 = vrot.slane %v862_v11, 1 }
 0x143   : > { %804 = vrot.lane.b32.xlu1 %v2211_v46, %s1866_s24  ;;  %v746_v46 = vsel %vm389_vm0, %v741_v18, %v745_v44 }
 0x144   : > { %841 = vrot.lane.b32.xlu0 %v2201_v6, %s1868_s26  ;;  %810 = vrot.lane.b32.xlu2 %v2413_v25, %s1866_s24 }
 0x145   : > { %v754_v32 = vpop.permute.xlu1 %753  ;;  %v2507_v51 = vpop.f32.mrf.mxu0 }
 0x146   : > { %v1345_v24 = vpack.c.bf16 %v2507_v51, %v2507_v51  ;;  %v789_v53 = vpop.permute.xlu0 %788  ;;  %v2513_v9 = vpop.permute.xlu2 %602  ;;  %v1040_v12 = vsel %vm1032_vm6, %v1007_v16, %v754_v32  ;;  %v898_v32 = vrot.slane %v1791_v19, 1 }
 0x147   : > { %v1073_v3 = vsel %vm1065_vm7, %v1040_v12, %v789_v53 }
 0x148   : > { %1378 = vst.msk [vmem:[%s2431_s11 + $0x8] sm:$0xf] %vm1375_vm12, %v1345_v24  ;;  %v1106_v36 = vsel %vm1098_vm8, %v1073_v3, %v2480_v35  ;;  %v855_v35 = vshrl.u32 %v1791_v19, 16 }
 0x14a   : > { %v860_v17 = vor.u32 %v859_v60, %v855_v35 }
 0x14b   : > { %847 = vrot.lane.b32.xlu1 %v2487_v30, %s1868_s26 }
 0x14c   : > { %894 = vrot.lane.b32.xlu0 %v746_v46, %s1869_s27  ;;  %v2525_v10 = vpop.f32.mrf.mxu1  ;;  %888 = vrot.lane.b32.xlu2 %v2232_v22, %s1869_s27  ;;  %v779_v22 = vrot.slane %v2487_v30, 1 }
 0x14d   : > { %v1351_v31 = vpack.c.bf16 %v2525_v10, %v2525_v10  ;;  %v795_v58 = vpop.permute.xlu1 %794  ;;  %v2529_v20 = vpop.f32.mrf.mxu0 }
 0x14e   : > { %v1346_v1 = vpack.c.bf16 %v2529_v20, %v2529_v20  ;;  %v832_v55 = vpop.permute.xlu0 %831  ;;  %v2544_v15 = vpop.permute.xlu2 %689  ;;  %v781_v4 = vsel %vm614_vm1, %v779_v22, %v780_v40 }
 0x14f   : > { %1384 = vst.msk [vmem:[%s2431_s11 + $0x20] sm:$0xf] %vm1375_vm12, %v1351_v31 }
 0x150   : > { %1379 = vst.msk [vmem:[%s2431_s11 + $0xc] sm:$0xf] %vm1375_vm12, %v1346_v1 }
 0x153   : > { %923 = vrot.lane.b32.xlu1 %v2247_v43, %s1870_s28  ;;  %v1046_v43 = vsel %vm1032_vm6, %v1013_v23, %v2463_v56 }
 0x154   : > { %v2556_v61 = vpop.f32.mrf.mxu1  ;;  %612 = vrot.lane.b32.xlu0 %v2403_v26, %s1864_s22  ;;  %929 = vrot.lane.b32.xlu2 %v781_v4, %s1870_s28  ;;  %v1079_v26 = vsel %vm1065_vm7, %v1046_v43, %v795_v58 }
 0x155   : > { %v1352_v5 = vpack.c.bf16 %v2556_v61, %v2556_v61  ;;  %v873_v33 = vpop.permute.xlu1 %872  ;;  %v1112_v0 = vsel %vm1098_vm8, %v1079_v26, %v832_v55  ;;  %v955_v55 = vsel %vm933_vm3, %v2074_v59, %v2513_v9 }
 0x156   : > { %v1139_v38 = vsel %vm1131_vm9, %v1106_v36, %v873_v33  ;;  %v908_v50 = vpop.permute.xlu0 %907  ;;  %v768_v2 = vpop.permute.xlu2 %767  ;;  %v1145_v13 = vsel %vm1131_vm9, %v1112_v0, %v2500_v42  ;;  %v899_v42 = vrot.slane %v853_v41, 1 }
 0x157   : > { %1385 = vst.msk [vmem:[%s2431_s11 + $0x24] sm:$0xf] %vm1375_vm12, %v1352_v5  ;;  %v1172_v48 = vsel %vm1164_vm10, %v1139_v38, %v908_v50 }
 0x158   : > { %1757 = vmatmul.msk.bf16.gmra.mxu0 %vm1217_vm11, %v1172_v48  ;;  %v900_v24 = vsel %vm614_vm1, %v898_v32, %v899_v42 }
 0x15b   : > { %693 = vrot.lane.b32.xlu1 %v2413_v25, %s1865_s23  ;;  %v865_v25 = vsel %vm389_vm0, %v860_v17, %v864_v57 }
 0x15c   : > { %777 = vrot.lane.b32.xlu0 %v746_v46, %s1867_s25  ;;  %730 = vrot.lane.b32.xlu2 %v2487_v30, %s1863_s21 }
 0x15d   : > { %v914_v56 = vpop.permute.xlu1 %913 }
 0x15e   : > { %v609_v21 = vpop.permute.xlu0 %608  ;;  %v1178_v52 = vsel %vm1164_vm10, %v1145_v13, %v914_v56  ;;  %v809_v49 = vpop.permute.xlu2 %808 }
 0x15f   : > { %1760 = vmatmul.msk.bf16.gmra.mxu1 %vm1217_vm11, %v1178_v52  ;;  %v961_v7 = vsel %vm933_vm3, %v2201_v6, %v609_v21 }
 0x160   : > { %v994_v23 = vsel %vm966_vm4, %v961_v7, %v2544_v15 }
 0x163   : > { %812 = vrot.lane.b32.xlu1 %v781_v4, %s1866_s24 }
 0x164   : > { %896 = vrot.lane.b32.xlu0 %v865_v25, %s1869_s27  ;;  %849 = vrot.lane.b32.xlu2 %v1791_v19, %s1868_s26 }
 0x165   : > { %v684_v18 = vpop.permute.xlu1 %683 }
 0x166   : > { %v721_v30 = vpop.permute.xlu0 %720  ;;  %v597_v44 = vpop.permute.xlu2 %596  ;;  %v988_v63 = vsel %vm966_vm4, %v955_v55, %v684_v18 }
 0x167   : > { %v1021_v22 = vsel %vm999_vm5, %v988_v63, %v721_v30  ;;  %v949_v17 = vsel %vm933_vm3, %v2136_v37, %v597_v44 }
 0x168   : > { %v1054_v3 = vsel %vm1032_vm6, %v1021_v22, %v768_v2 }
 0x16b   : > { %931 = vrot.lane.b32.xlu1 %v900_v24, %s1870_s28  ;;  %v2590_v53 = vpop.f32.mrf.mxu2 }
 0x16c   : > { %v1359_v46 = vpack.c.bf16 %v2590_v53, %v2590_v53 }
 0x16d   : > { %v727_v54 = vpop.permute.xlu1 %726 }
 0x16e   : > { %1392 = vst.msk [vmem:[%s2431_s11 + $0x40] sm:$0xf] %vm1375_vm12, %v1359_v46  ;;  %v774_v34 = vpop.permute.xlu0 %773  ;;  %v678_v29 = vpop.permute.xlu2 %677  ;;  %v1027_v4 = vsel %vm999_vm5, %v994_v23, %v727_v54 }
 0x16f   : > { %v1060_v50 = vsel %vm1032_vm6, %v1027_v4, %v774_v34  ;;  %v982_v57 = vsel %vm966_vm4, %v949_v17, %v678_v29 }
 0x170   : > { %v1093_v26 = vsel %vm1065_vm7, %v1060_v50, %v809_v49 }
 0x173   : > { %v2596_v31 = vpop.f32.mrf.mxu2 }
 0x174   : > { %v1360_v58 = vpack.c.bf16 %v2596_v31, %v2596_v31 }
 0x175   : > { %v803_v16 = vpop.permute.xlu1 %802 }
 0x176   : > { %1393 = vst.msk [vmem:[%s2431_s11 + $0x44] sm:$0xf] %vm1375_vm12, %v1360_v58  ;;  %v840_v1 = vpop.permute.xlu0 %839  ;;  %v715_v47 = vpop.permute.xlu2 %714  ;;  %v1087_v9 = vsel %vm1065_vm7, %v1054_v3, %v803_v16 }
 0x177   : > { %v1120_v5 = vsel %vm1098_vm8, %v1087_v9, %v840_v1  ;;  %v1015_v21 = vsel %vm999_vm5, %v982_v57, %v715_v47 }
 0x17d   : > { %v846_v12 = vpop.permute.xlu1 %845 }
 0x17e   : > { %v2607_v40 = vpop.f32.mrf.mxu0  ;;  %v887_v19 = vpop.permute.xlu0 %886  ;;  %v1126_v2 = vsel %vm1098_vm8, %v1093_v26, %v846_v12 }
 0x17f   : > { %v1347_v45 = vpack.c.bf16 %v2607_v40, %v2607_v40  ;;  %v834_v59 = vpop.permute.xlu2 %833  ;;  %v1153_v6 = vsel %vm1131_vm9, %v1120_v5, %v887_v19 }
 0x181   : > { %1380 = vst.msk [vmem:[%s2431_s11 + $0x10] sm:$0xf] %vm1375_vm12, %v1347_v45 }
 0x185   : > { %v893_v33 = vpop.permute.xlu1 %892  ;;  %v2621_v36 = vpop.f32.mrf.mxu1 }
 0x186   : > { %v1353_v41 = vpack.c.bf16 %v2621_v36, %v2621_v36  ;;  %v2626_v39 = vpop.f32.mrf.mxu0  ;;  %v922_v43 = vpop.permute.xlu0 %921  ;;  %v1159_v35 = vsel %vm1131_vm9, %v1126_v2, %v893_v33 }
 0x187   : > { %v1348_v38 = vpack.c.bf16 %v2626_v39, %v2626_v39  ;;  %v1186_v15 = vsel %vm1164_vm10, %v1153_v6, %v922_v43  ;;  %v605_v48 = vpop.permute.xlu2 %604 }
 0x188   : > { %1386 = vst.msk [vmem:[%s2431_s11 + $0x28] sm:$0xf] %vm1375_vm12, %v1353_v41  ;;  %1764 = vmatmul.msk.bf16.gmra.mxu2 %vm1217_vm11, %v1186_v15  ;;  %v957_v47 = vsel %vm933_vm3, %v2235_v27, %v605_v48 }
 0x189   : > { %1381 = vst.msk [vmem:[%s2431_s11 + $0x14] sm:$0xf] %vm1375_vm12, %v1348_v38 }
 0x18d   : > { %v928_v60 = vpop.permute.xlu1 %927  ;;  %v2640_v11 = vpop.f32.mrf.mxu1 }
 0x18e   : > { %v1354_v0 = vpack.c.bf16 %v2640_v11, %v2640_v11  ;;  %v762_v56 = vpop.permute.xlu0 %761  ;;  %v1192_v13 = vsel %vm1164_vm10, %v1159_v35, %v928_v60 }
 0x18f   : > { %1767 = vmatmul.msk.bf16.gmra.mxu3 %vm1217_vm11, %v1192_v13  ;;  %v692_v49 = vpop.permute.xlu2 %691  ;;  %v1048_v25 = vsel %vm1032_vm6, %v1015_v21, %v762_v56 }
 0x190   : > { %1387 = vst.msk [vmem:[%s2431_s11 + $0x2c] sm:$0xf] %vm1375_vm12, %v1354_v0 }
 0x195   : > { %v797_v52 = vpop.permute.xlu1 %796 }
 0x196   : > { %v881_v32 = vpop.permute.xlu0 %880  ;;  %v1081_v42 = vsel %vm1065_vm7, %v1048_v25, %v797_v52 }
 0x197   : > { %v1114_v18 = vsel %vm1098_vm8, %v1081_v42, %v834_v59  ;;  %v770_v46 = vpop.permute.xlu2 %769 }
 0x198   : > { %v1147_v30 = vsel %vm1131_vm9, %v1114_v18, %v881_v32 }
 0x19d   : > { %v916_v37 = vpop.permute.xlu1 %915 }
 0x19e   : > { %v611_v44 = vpop.permute.xlu0 %610  ;;  %v1180_v24 = vsel %vm1164_vm10, %v1147_v30, %v916_v37 }
 0x19f   : > { %1761 = vmatmul.msk.bf16.gmra.mxu1 %vm1217_vm11, %v1180_v24  ;;  %v811_v29 = vpop.permute.xlu2 %810  ;;  %v963_v1 = vsel %vm933_vm3, %v2229_v14, %v611_v44 }
 0x1a0   : > { %v996_v12 = vsel %vm966_vm4, %v963_v1, %v692_v49 }
 0x1a5   : > { %v686_v54 = vpop.permute.xlu1 %685 }
 0x1a6   : > { %v723_v34 = vpop.permute.xlu0 %722  ;;  %v990_v45 = vsel %vm966_vm4, %v957_v47, %v686_v54 }
 0x1a7   : > { %v889_v55 = vpop.permute.xlu2 %888  ;;  %v1023_v3 = vsel %vm999_vm5, %v990_v45, %v723_v34 }
 0x1a8   : > { %v1056_v4 = vsel %vm1032_vm6, %v1023_v3, %v770_v46 }
 0x1ad   : > { %v729_v58 = vpop.permute.xlu1 %728 }
 0x1ae   : > { %v776_v16 = vpop.permute.xlu0 %775  ;;  %v1029_v19 = vsel %vm999_vm5, %v996_v12, %v729_v58 }
 0x1af   : > { %v1062_v7 = vsel %vm1032_vm6, %v1029_v19, %v776_v16  ;;  %v930_v23 = vpop.permute.xlu2 %929 }
 0x1b0   : > { %v1095_v9 = vsel %vm1065_vm7, %v1062_v7, %v811_v29 }
 0x1b5   : > { %v805_v63 = vpop.permute.xlu1 %804 }
 0x1b6   : > { %v842_v22 = vpop.permute.xlu0 %841  ;;  %v1089_v6 = vsel %vm1065_vm7, %v1056_v4, %v805_v63 }
 0x1b7   : > { %v1122_v38 = vsel %vm1098_vm8, %v1089_v6, %v842_v22  ;;  %v731_v21 = vpop.permute.xlu2 %730  ;;  %v1408_v22 = vadd.f32 %v2454_v8, %v2433_v62 }
 0x1b8   : > { %v1155_v2 = vsel %vm1131_vm9, %v1122_v38, %v889_v55 }
 0x1b9   : > { %v1409_v19 = vadd.f32 %v1408_v22, %v2507_v51 }
 0x1bb   : > { %v2667_v59 = vpop.f32.mrf.mxu2  ;;  %v1410_v7 = vadd.f32 %v1409_v19, %v2529_v20 }
 0x1bc   : > { %v1361_v14 = vpack.c.bf16 %v2667_v59, %v2667_v59 }
 0x1bd   : > { %v848_v27 = vpop.permute.xlu1 %847 }
 0x1be   : > { %1394 = vst.msk [vmem:[%s2431_s11 + $0x48] sm:$0xf] %vm1375_vm12, %v1361_v14  ;;  %v1128_v5 = vsel %vm1098_vm8, %v1095_v9, %v848_v27  ;;  %v895_v33 = vpop.permute.xlu0 %894  ;;  %v1411_v27 = vadd.f32 %v1410_v7, %v2607_v40 }
 0x1bf   : > { %v1161_v41 = vsel %vm1131_vm9, %v1128_v5, %v895_v33  ;;  %v850_v37 = vpop.permute.xlu2 %849 }
 0x1c0   : > { %v1194_v43 = vsel %vm1164_vm10, %v1161_v41, %v930_v23  ;;  %v1412_v23 = vadd.f32 %v1411_v27, %v2626_v39 }
 0x1c1   : > { %1768 = vmatmul.msk.bf16.gmra.mxu3 %vm1217_vm11, %v1194_v43 }
 0x1c2   : > { %v2681_v15 = vpop.f32.mrf.mxu3 }
 0x1c3   : > { %v1367_v50 = vpack.c.bf16 %v2681_v15, %v2681_v15  ;;  %v2685_v26 = vpop.f32.mrf.mxu2 }
 0x1c4   : > { %v1362_v48 = vpack.c.bf16 %v2685_v26, %v2685_v26 }
 0x1c5   : > { %1400 = vst.msk [vmem:[%s2431_s11 + $0x60] sm:$0xf] %vm1375_vm12, %v1367_v50  ;;  %v924_v35 = vpop.permute.xlu1 %923 }
 0x1c6   : > { %1395 = vst.msk [vmem:[%s2431_s11 + $0x4c] sm:$0xf] %vm1375_vm12, %v1362_v48  ;;  %v1188_v60 = vsel %vm1164_vm10, %v1155_v2, %v924_v35  ;;  %v613_v0 = vpop.permute.xlu0 %612 }
 0x1c7   : > { %1765 = vmatmul.msk.bf16.gmra.mxu2 %vm1217_vm11, %v1188_v60  ;;  %v965_v17 = vsel %vm933_vm3, %v2378_v28, %v613_v0 }
 0x1ca   : > { %v2696_v56 = vpop.f32.mrf.mxu3 }
 0x1cb   : > { %v1368_v13 = vpack.c.bf16 %v2696_v56, %v2696_v56 }
 0x1cd   : > { %1401 = vst.msk [vmem:[%s2431_s11 + $0x64] sm:$0xf] %vm1375_vm12, %v1368_v13  ;;  %v694_v57 = vpop.permute.xlu1 %693 }
 0x1ce   : > { %v998_v52 = vsel %vm966_vm4, %v965_v17, %v694_v57  ;;  %v778_v49 = vpop.permute.xlu0 %777 }
 0x1cf   : > { %v1031_v25 = vsel %vm999_vm5, %v998_v52, %v731_v21 }
 0x1d0   : > { %v1064_v18 = vsel %vm1032_vm6, %v1031_v25, %v778_v49 }
 0x1d5   : > { %v813_v32 = vpop.permute.xlu1 %812  ;;  %v2706_v42 = vpop.f32.mrf.mxu0 }
 0x1d6   : > { %v1349_v30 = vpack.c.bf16 %v2706_v42, %v2706_v42  ;;  %v1097_v28 = vsel %vm1065_vm7, %v1064_v18, %v813_v32  ;;  %v897_v24 = vpop.permute.xlu0 %896  ;;  %v1413_v4 = vadd.f32 %v1412_v23, %v2706_v42 }
 0x1d7   : > { %v1130_v44 = vsel %vm1098_vm8, %v1097_v28, %v850_v37 }
 0x1d8   : > { %1382 = vst.msk [vmem:[%s2431_s11 + $0x18] sm:$0xf] %vm1375_vm12, %v1349_v30  ;;  %v1163_v54 = vsel %vm1131_vm9, %v1130_v44, %v897_v24 }
 0x1dc   : > { %v2715_v46 = vpop.f32.mrf.mxu1 }
 0x1dd   : > { %v1355_v34 = vpack.c.bf16 %v2715_v46, %v2715_v46  ;;  %v932_v29 = vpop.permute.xlu1 %931  ;;  %v2720_v58 = vpop.f32.mrf.mxu0 }
 0x1de   : > { %v1350_v16 = vpack.c.bf16 %v2720_v58, %v2720_v58  ;;  %v1196_v1 = vsel %vm1164_vm10, %v1163_v54, %v932_v29  ;;  %v1414_v33 = vadd.f32 %v1413_v4, %v2720_v58 }
 0x1df   : > { %1388 = vst.msk [vmem:[%s2431_s11 + $0x30] sm:$0xf] %vm1375_vm12, %v1355_v34  ;;  %1769 = vmatmul.msk.bf16.gmra.mxu3 %vm1217_vm11, %v1196_v1 }
 0x1e0   : > { %1383 = vst.msk [vmem:[%s2431_s11 + $0x1c] sm:$0xf] %vm1375_vm12, %v1350_v16  ;;  %v1415_v38 = vadd.f32 %v1414_v33, %v2525_v10 }
 0x1e2   : > { %v1416_v50 = vadd.f32 %v1415_v38, %v2556_v61 }
 0x1e4   : > { %v2730_v55 = vpop.f32.mrf.mxu1  ;;  %v1417_v35 = vadd.f32 %v1416_v50, %v2621_v36 }
 0x1e5   : > { %v1356_v47 = vpack.c.bf16 %v2730_v55, %v2730_v55 }
 0x1e6   : > { %v1418_v60 = vadd.f32 %v1417_v35, %v2640_v11 }
 0x1e7   : > { %1389 = vst.msk [vmem:[%s2431_s11 + $0x34] sm:$0xf] %vm1375_vm12, %v1356_v47 }
 0x1e8   : > { %v1419_v0 = vadd.f32 %v1418_v60, %v2715_v46 }
 0x1ea   : > { %v1420_v13 = vadd.f32 %v1419_v0, %v2730_v55 }
 0x20b   : > { %v2736_v63 = vpop.f32.mrf.mxu2 }
 0x20c   : > { %v1363_v12 = vpack.c.bf16 %v2736_v63, %v2736_v63 }
 0x20e   : > { %1396 = vst.msk [vmem:[%s2431_s11 + $0x50] sm:$0xf] %vm1375_vm12, %v1363_v12 }
 0x212   : > { %v2745_v45 = vpop.f32.mrf.mxu3 }
 0x213   : > { %v1369_v3 = vpack.c.bf16 %v2745_v45, %v2745_v45  ;;  %v2750_v14 = vpop.f32.mrf.mxu2 }
 0x214   : > { %v1364_v9 = vpack.c.bf16 %v2750_v14, %v2750_v14 }
 0x215   : > { %1402 = vst.msk [vmem:[%s2431_s11 + $0x68] sm:$0xf] %vm1375_vm12, %v1369_v3 }
 0x216   : > { %1397 = vst.msk [vmem:[%s2431_s11 + $0x54] sm:$0xf] %vm1375_vm12, %v1364_v9 }
 0x21a   : > { %v2761_v5 = vpop.f32.mrf.mxu3 }
 0x21b   : > { %v1370_v6 = vpack.c.bf16 %v2761_v5, %v2761_v5 }
 0x21c   : > { %v2766_v41 = vpop.f32.mrf.mxu1 }
 0x21d   : > { %1403 = vst.msk [vmem:[%s2431_s11 + $0x6c] sm:$0xf] %vm1375_vm12, %v1370_v6  ;;  %v1357_v43 = vpack.c.bf16 %v2766_v41, %v2766_v41  ;;  %v1421_v17 = vadd.f32 %v1420_v13, %v2766_v41 }
 0x21f   : > { %1390 = vst.msk [vmem:[%s2431_s11 + $0x38] sm:$0xf] %vm1375_vm12, %v1357_v43 }
 0x224   : > { %v2776_v48 = vpop.f32.mrf.mxu1 }
 0x225   : > { %v1358_v2 = vpack.c.bf16 %v2776_v48, %v2776_v48  ;;  %v1422_v57 = vadd.f32 %v1421_v17, %v2776_v48 }
 0x227   : > { %1391 = vst.msk [vmem:[%s2431_s11 + $0x3c] sm:$0xf] %vm1375_vm12, %v1358_v2  ;;  %v1423_v21 = vadd.f32 %v1422_v57, %v2590_v53 }
 0x229   : > { %v1424_v52 = vadd.f32 %v1423_v21, %v2596_v31 }
 0x22b   : > { %v1425_v49 = vadd.f32 %v1424_v52, %v2667_v59 }
 0x22d   : > { %v1426_v18 = vadd.f32 %v1425_v49, %v2685_v26 }
 0x22f   : > { %v1427_v37 = vadd.f32 %v1426_v18, %v2736_v63 }
 0x231   : > { %v1428_v54 = vadd.f32 %v1427_v37, %v2750_v14 }
 0x244   : > { %v2791_v25 = vpop.f32.mrf.mxu3 }
 0x245   : > { %v1371_v32 = vpack.c.bf16 %v2791_v25, %v2791_v25 }
 0x247   : > { %1404 = vst.msk [vmem:[%s2431_s11 + $0x70] sm:$0xf] %vm1375_vm12, %v1371_v32 }
 0x24a   : > { %v2798_v30 = vpop.f32.mrf.mxu2 }
 0x24b   : > { %v1365_v28 = vpack.c.bf16 %v2798_v30, %v2798_v30  ;;  %v1429_v34 = vadd.f32 %v1428_v54, %v2798_v30 }
 0x24c   : > { %v2803_v44 = vpop.f32.mrf.mxu3 }
 0x24d   : > { %1398 = vst.msk [vmem:[%s2431_s11 + $0x58] sm:$0xf] %vm1375_vm12, %v1365_v28  ;;  %v1372_v24 = vpack.c.bf16 %v2803_v44, %v2803_v44 }
 0x24f   : > { %1405 = vst.msk [vmem:[%s2431_s11 + $0x74] sm:$0xf] %vm1375_vm12, %v1372_v24 }
 0x252   : > { %v2813_v29 = vpop.f32.mrf.mxu2 }
 0x253   : > { %v1366_v16 = vpack.c.bf16 %v2813_v29, %v2813_v29  ;;  %v1430_v1 = vadd.f32 %v1429_v34, %v2813_v29 }
 0x255   : > { %1399 = vst.msk [vmem:[%s2431_s11 + $0x5c] sm:$0xf] %vm1375_vm12, %v1366_v16  ;;  %v1431_v47 = vadd.f32 %v1430_v1, %v2681_v15 }
 0x257   : > { %v1432_v12 = vadd.f32 %v1431_v47, %v2696_v56 }
 0x259   : > { %v1433_v22 = vadd.f32 %v1432_v12, %v2745_v45 }
 0x25b   : > { %v1434_v19 = vadd.f32 %v1433_v22, %v2761_v5 }
 0x25d   : > { %v1435_v9 = vadd.f32 %v1434_v19, %v2791_v25 }
 0x25f   : > { %v1436_v27 = vadd.f32 %v1435_v9, %v2803_v44 }
 0x262   : > { %v2825_v7 = vpop.f32.mrf.mxu3 }
 0x263   : > { %v1373_v3 = vpack.c.bf16 %v2825_v7, %v2825_v7  ;;  %v1437_v23 = vadd.f32 %v1436_v27, %v2825_v7 }
 0x265   : > { %1406 = vst.msk [vmem:[%s2431_s11 + $0x78] sm:$0xf] %vm1375_vm12, %v1373_v3 }
 0x26a   : > { %v2834_v4 = vpop.f32.mrf.mxu3 }
 0x26b   : > { %v1374_v33 = vpack.c.bf16 %v2834_v4, %v2834_v4  ;;  %v1438_v6 = vadd.f32 %v1437_v23, %v2834_v4 }
 0x26d   : > { %1407 = vst.msk [vmem:[%s2431_s11 + $0x7c] sm:$0xf] %vm1375_vm12, %v1374_v33  ;;  %v1439_v43 = vrot.slane %v1438_v6, 4 }
 0x26f   : > { %v1440_v38 = vadd.f32 %v1439_v43, %v1438_v6 }
 0x271   : > { %v1441_v50 = vrot.slane %v1440_v38, 2 }
 0x273   : > { %v1442_v2 = vadd.f32 %v1441_v50, %v1440_v38 }
 0x275   : > { %v1443_v35 = vrot.slane %v1442_v2, 1 }
 0x277   : > { %v2841_v60 = vadd.f32 %v1443_v35, %v1442_v2 }
 0x279   : > { %v2844_v0 = vmul.f32 0.00390625, %v2841_v60 }
 0x27b   : > { %v1446_v13 = vsub.f32 %v2433_v62, %v2844_v0  ;;  %v1447_v17 = vsub.f32 %v2454_v8, %v2844_v0  ;;  %v1448_v57 = vsub.f32 %v2507_v51, %v2844_v0  ;;  %v1449_v49 = vsub.f32 %v2529_v20, %v2844_v0 }
 0x27c   : > { %v1450_v32 = vsub.f32 %v2607_v40, %v2844_v0  ;;  %v1451_v37 = vsub.f32 %v2626_v39, %v2844_v0  ;;  %v1452_v8 = vsub.f32 %v2706_v42, %v2844_v0  ;;  %v1453_v34 = vsub.f32 %v2720_v58, %v2844_v0 }
 0x27d   : > { %v1478_v21 = vmul.f32 %v1446_v13, %v1446_v13  ;;  %v1479_v52 = vmul.f32 %v1447_v17, %v1447_v17  ;;  %v1480_v18 = vmul.f32 %v1448_v57, %v1448_v57  ;;  %v1481_v62 = vmul.f32 %v1449_v49, %v1449_v49 }
 0x27e   : > { %v1482_v54 = vmul.f32 %v1450_v32, %v1450_v32  ;;  %v1483_v16 = vmul.f32 %v1451_v37, %v1451_v37  ;;  %v1454_v40 = vsub.f32 %v2525_v10, %v2844_v0  ;;  %v1484_v1 = vmul.f32 %v1452_v8, %v1452_v8 }
 0x27f   : > { %v1510_v28 = vadd.f32 %v1479_v52, %v1478_v21  ;;  %v1455_v39 = vsub.f32 %v2556_v61, %v2844_v0  ;;  %v1485_v12 = vmul.f32 %v1453_v34, %v1453_v34  ;;  %v1456_v42 = vsub.f32 %v2621_v36, %v2844_v0 }
 0x280   : > { %v1486_v19 = vmul.f32 %v1454_v40, %v1454_v40  ;;  %v1457_v58 = vsub.f32 %v2640_v11, %v2844_v0  ;;  %v1458_v10 = vsub.f32 %v2715_v46, %v2844_v0  ;;  %v1459_v61 = vsub.f32 %v2730_v55, %v2844_v0 }
 0x281   : > { %v1511_v24 = vadd.f32 %v1510_v28, %v1480_v18  ;;  %v1487_v9 = vmul.f32 %v1455_v39, %v1455_v39  ;;  %v1488_v23 = vmul.f32 %v1456_v42, %v1456_v42  ;;  %v1460_v36 = vsub.f32 %v2766_v41, %v2844_v0 }
 0x282   : > { %v1489_v6 = vmul.f32 %v1457_v58, %v1457_v58  ;;  %v1490_v38 = vmul.f32 %v1458_v10, %v1458_v10  ;;  %v1461_v11 = vsub.f32 %v2776_v48, %v2844_v0  ;;  %v1491_v2 = vmul.f32 %v1459_v61, %v1459_v61 }
 0x283   : > { %v1512_v51 = vadd.f32 %v1511_v24, %v1481_v62  ;;  %v1462_v46 = vsub.f32 %v2590_v53, %v2844_v0  ;;  %v1492_v13 = vmul.f32 %v1460_v36, %v1460_v36  ;;  %v1463_v55 = vsub.f32 %v2596_v31, %v2844_v0 }
 0x284   : > { %v1493_v57 = vmul.f32 %v1461_v11, %v1461_v11  ;;  %v1464_v41 = vsub.f32 %v2667_v59, %v2844_v0  ;;  %v1465_v48 = vsub.f32 %v2685_v26, %v2844_v0  ;;  %v1466_v53 = vsub.f32 %v2736_v63, %v2844_v0 }
 0x285   : > { %v1513_v20 = vadd.f32 %v1512_v51, %v1482_v54  ;;  %v1494_v52 = vmul.f32 %v1462_v46, %v1462_v46  ;;  %v1495_v32 = vmul.f32 %v1463_v55, %v1463_v55  ;;  %v1467_v31 = vsub.f32 %v2750_v14, %v2844_v0 }
 0x286   : > { %v1496_v28 = vmul.f32 %v1464_v41, %v1464_v41  ;;  %v1497_v62 = vmul.f32 %v1465_v48, %v1465_v48  ;;  %v1468_v59 = vsub.f32 %v2798_v30, %v2844_v0  ;;  %v1498_v8 = vmul.f32 %v1466_v53, %v1466_v53 }
 0x287   : > { %v1514_v47 = vadd.f32 %v1513_v20, %v1483_v16  ;;  %v1469_v26 = vsub.f32 %v2813_v29, %v2844_v0  ;;  %v1499_v51 = vmul.f32 %v1467_v31, %v1467_v31  ;;  %v1470_v63 = vsub.f32 %v2681_v15, %v2844_v0 }
 0x288   : > { %v1500_v16 = vmul.f32 %v1468_v59, %v1468_v59  ;;  %v1471_v14 = vsub.f32 %v2696_v56, %v2844_v0  ;;  %v1472_v30 = vsub.f32 %v2745_v45, %v2844_v0  ;;  %v1473_v29 = vsub.f32 %v2761_v5, %v2844_v0 }
 0x289   : > { %v1515_v22 = vadd.f32 %v1514_v47, %v1484_v1  ;;  %v1501_v40 = vmul.f32 %v1469_v26, %v1469_v26  ;;  %v1502_v47 = vmul.f32 %v1470_v63, %v1470_v63  ;;  %v1474_v15 = vsub.f32 %v2791_v25, %v2844_v0 }
 0x28a   : > { %v1504_v42 = vmul.f32 %v1472_v30, %v1472_v30  ;;  %v1475_v56 = vsub.f32 %v2803_v44, %v2844_v0  ;;  %v1476_v45 = vsub.f32 %v2825_v7, %v2844_v0  ;;  %v1477_v5 = vsub.f32 %v2834_v4, %v2844_v0 }
 0x28b   : > { %v1516_v3 = vadd.f32 %v1515_v22, %v1485_v12  ;;  %v1503_v12 = vmul.f32 %v1471_v14, %v1471_v14  ;;  %v1547_v11 = vmul.f32 %v2844_v0, %v2844_v0 }
 0x28c   : > { %v1507_v10 = vmul.f32 %v1475_v56, %v1475_v56  ;;  %v1509_v25 = vmul.f32 %v1477_v5, %v1477_v5 }
 0x28d   : > { %v1517_v27 = vadd.f32 %v1516_v3, %v1486_v19  ;;  %v1505_v3 = vmul.f32 %v1473_v29, %v1473_v29 }
 0x28f   : > { %v1518_v33 = vadd.f32 %v1517_v27, %v1487_v9  ;;  %v1506_v9 = vmul.f32 %v1474_v15, %v1474_v15 }
 0x291   : > { %v1519_v43 = vadd.f32 %v1518_v33, %v1488_v23  ;;  %v1508_v33 = vmul.f32 %v1476_v45, %v1476_v45 }
 0x293   : > { %v1520_v50 = vadd.f32 %v1519_v43, %v1489_v6 }
 0x295   : > { %v1521_v35 = vadd.f32 %v1520_v50, %v1490_v38 }
 0x297   : > { %v1522_v17 = vadd.f32 %v1521_v35, %v1491_v2  ;;  %v1548_v35 = vmul.f32 256.0, %v1547_v11 }
 0x299   : > { %v1523_v21 = vadd.f32 %v1522_v17, %v1492_v13  ;;  %v1871_v13 = vmov (%p1552_p5), 0.0  }
 0x29a   : > { %1558 = vst [vmem:[%s2937_s3] sm:$0x7] (%p1552_p5), %v1871_v13 }
 0x29b   : > { %v1524_v49 = vadd.f32 %v1523_v21, %v1493_v57 }
 0x29d   : > { %v1525_v18 = vadd.f32 %v1524_v49, %v1494_v52 }
 0x29f   : > { %v1526_v37 = vadd.f32 %v1525_v18, %v1495_v32 }
 0x2a1   : > { %v1527_v24 = vadd.f32 %v1526_v37, %v1496_v28 }
 0x2a3   : > { %v1528_v54 = vadd.f32 %v1527_v24, %v1497_v62 }
 0x2a5   : > { %v1529_v34 = vadd.f32 %v1528_v54, %v1498_v8 }
 0x2a7   : > { %v1530_v20 = vadd.f32 %v1529_v34, %v1499_v51 }
 0x2a9   : > { %v1531_v1 = vadd.f32 %v1530_v20, %v1500_v16 }
 0x2ab   : > { %v1532_v39 = vadd.f32 %v1531_v1, %v1501_v40 }
 0x2ad   : > { %v1533_v22 = vadd.f32 %v1532_v39, %v1502_v47 }
 0x2af   : > { %v1534_v19 = vadd.f32 %v1533_v22, %v1503_v12 }
 0x2b1   : > { %v1535_v58 = vadd.f32 %v1534_v19, %v1504_v42 }
 0x2b3   : > { %v1536_v27 = vadd.f32 %v1535_v58, %v1505_v3 }
 0x2b5   : > { %v1537_v23 = vadd.f32 %v1536_v27, %v1506_v9 }
 0x2b7   : > { %v1538_v61 = vadd.f32 %v1537_v23, %v1507_v10 }
 0x2b9   : > { %v1539_v6 = vadd.f32 %v1538_v61, %v1508_v33 }
 0x2bb   : > { %v1540_v43 = vadd.f32 %v1539_v6, %v1509_v25 }
 0x2bd   : > { %v1541_v36 = vrot.slane %v1540_v43, 4 }
 0x2bf   : > { %v1542_v38 = vadd.f32 %v1541_v36, %v1540_v43 }
 0x2c1   : > { %v1543_v44 = vrot.slane %v1542_v38, 2 }
 0x2c3   : > { %v1544_v50 = vadd.f32 %v1543_v44, %v1542_v38 }
 0x2c5   : > { %v1545_v7 = vrot.slane %v1544_v50, 1 }
 0x2c6   : > { %1557 = sbr.rel (!%p1552_p5) target bundleno = 715 (0x2cb), region = 32 }
 0x2c7   : > { %v1546_v2 = vadd.f32 %v1545_v7, %v1544_v50 }
 0x2c9   : > { %v1550_v4 = vsel %vm1549_vm13, %v2841_v60, %v1546_v2 }
 0x2ca   : > { %v1551_v46 = vsel %vm1250_vm2, %v1550_v4, %v1548_v35 }
 0x2cb PF: > { %v1561_v0 = vld [vmem:[%s2937_s3] sm:$0x7] }
 0x2cc   : > { %v1562_v17 = vadd.f32 %v1561_v0, %v1551_v46 }
 0x2ce   : > { %1563 = vst [vmem:[%s2937_s3] sm:$0x7] %v1562_v17 }
 0x2cf PF: > { %s14_s14 = sadd.s32 1, %s1861_s14   ;;  %s2938_s12 = smov %s1857_s13 }
 0x2d0   : > { %p11_p6 = scmp.ge.s32.totalorder %s14_s14, 4   ;;  %s2939_s13 = smov %s2941_s15 }
 0x2d2   :  { %13 = sbr.rel (!%p11_p6) target bundleno = 2 (0x2), region = 74 }

</bundles_post_ra>
